<compile_context>
chip_gen: v5e
topology: v5e:2x2
jax: 0.10.0
libtpu: 0.0.40
codegen_flags: <defaults>
</compile_context>

<pallas_src>
import functools
import math

import jax
import jax.numpy as jnp
from jax import lax
from jax.experimental import pallas as pl
from jax.experimental.pallas import tpu as pltpu

_MXU_DTYPE = jnp.bfloat16


def _layernorm(x, gamma, beta, eps=1e-8):
    # PyTorch nn.LayerNorm: biased variance, eps inside the sqrt.
    mu = jnp.mean(x, axis=-1, keepdims=True)
    xc = x - mu
    var = jnp.mean(xc * xc, axis=-1, keepdims=True)
    return xc * lax.rsqrt(var + eps) * gamma + beta


def _fused_stack_kernel(num_heads, seq_len, causality,
                        # inputs
                        x_ref,
                        ln1_g, ln1_b, wq, bq, wkv, bkv, wo, bo,
                        ln2_g, ln2_b, w1, b1, w2, b2,
                        last_g, last_b,
                        # output / scratch
                        out_ref, h_ref):
    """grid = (batch_tiles, num_layers); one transformer block per grid step.

    h_ref (VMEM scratch, (M, K) f32) carries the activation across the layer axis so
    it never round-trips through HBM between layers.
    """
    layer = pl.program_id(1)
    num_layers = pl.num_programs(1)

    M, K = h_ref.shape                  # M = batch_tile * seq_len rows
    H = num_heads
    T = seq_len
    dh = K // H
    bt = M // T                         # sequences in this batch tile
    G = bt * H                          # one (T, T) attention problem per (seq, head)

    @pl.when(layer == 0)
    def _init():
        h_ref[...] = x_ref[...].astype(jnp.float32)

    x = h_ref[...]                      # (M, K) f32 residual stream

    # --- attention layernorm (queries only, as in the reference) ---
    q_in = _layernorm(x, ln1_g[0], ln1_b[0])          # f32, kept for the residual

    # --- projections: bf16 into the MXU, f32 accumulation.  1/sqrt(dh) is folded into
    #     wq/bq by the wrapper; K and V share one fused (K, 2K) weight. ---
    q = jnp.dot(q_in.astype(_MXU_DTYPE), wq[0],
                preferred_element_type=jnp.float32) + bq[0]
    kv = jnp.dot(x.astype(_MXU_DTYPE), wkv[0],
                 preferred_element_type=jnp.float32) + bkv[0]
    q = q.astype(_MXU_DTYPE)
    kv = kv.astype(_MXU_DTYPE)

    # --- head split: (M, K) -> (G, T, dh) via static lane slices + leading-axis
    #     concat (no (N, N) row packing; scores below are (G, T, T)). ---
    def split_heads(z, off):
        return jnp.concatenate(
            [z[:, off + h * dh: off + (h + 1) * dh].reshape(bt, T, dh)
             for h in range(H)], axis=0)

    qh = split_heads(q, 0)
    kh = split_heads(kv, 0)
    vh = split_heads(kv, K)

    # --- batched scores + softmax; only a (T, T) causal bias is needed ---
    s = jnp.einsum("gqd,gkd->gqk", qh, kh, preferred_element_type=jnp.float32)
    if causality:
        row = lax.broadcasted_iota(jnp.int32, (T, T), 0)
        col = lax.broadcasted_iota(jnp.int32, (T, T), 1)
        causal_bias = jnp.where(col <= row, 0.0, -1e30).astype(jnp.float32)
        s = s + causal_bias[None, :, :]
    s = s - jnp.max(s, axis=-1, keepdims=True)
    p = jnp.exp(s)
    p = p * pl.reciprocal(jnp.sum(p, axis=-1, keepdims=True), approx=True)

    o = jnp.einsum("gqk,gkd->gqd", p.astype(_MXU_DTYPE), vh,
                   preferred_element_type=jnp.float32)          # (G, T, dh) f32

    # --- head merge: (G, T, dh) -> (M, K), then output projection ---
    attn = jnp.concatenate(
        [o[h * bt:(h + 1) * bt].reshape(M, dh) for h in range(H)], axis=1)
    attn = jnp.dot(attn.astype(_MXU_DTYPE), wo[0],
                   preferred_element_type=jnp.float32) + bo[0]

    # seqs = Q + mha_outputs  (residual with the layernormed query)
    h_res = q_in + attn

    # --- forward layernorm + PointWiseFeedForward (two 1x1 convs == per-row MLP);
    #     residual is with the layernormed input, exactly as in the reference ---
    h2 = _layernorm(h_res, ln2_g[0], ln2_b[0])
    f = jnp.dot(h2.astype(_MXU_DTYPE), w1[0], preferred_element_type=jnp.float32) + b1[0]
    f = jnp.maximum(f, 0.0)
    f = jnp.dot(f.astype(_MXU_DTYPE), w2[0], preferred_element_type=jnp.float32) + b2[0]
    h_new = h2 + f

    h_ref[...] = h_new

    @pl.when(layer == num_layers - 1)
    def _final():
        out_ref[...] = _layernorm(h_new, last_g[...], last_b[...]).astype(out_ref.dtype)


_WEIGHT_ORDER = ("ln1_g", "ln1_b", "wq", "bq", "wkv", "bkv", "wo", "bo",
                 "ln2_g", "ln2_b", "w1", "b1", "w2", "b2")


def _default_batch_tile(B, T):
    """>=2 'parallel' tiles when two TensorCores are available (v7x); otherwise one
    big tile (v5e/v6e single TC) so each layer's weights stream from HBM exactly once."""
    num_cores = 1
    try:
        num_cores = int(getattr(jax.devices()[0], "num_cores", 1) or 1)
    except Exception:
        pass
    if num_cores >= 2 and B % 2 == 0 and ((B // 2) * T) % 8 == 0:
        return B // 2
    return B


def _vmem_bytes_estimate(M, T, K, H, per_layer_weight_bytes):
    act = M * K * 4
    G = (M // T) * H
    dh = K // H
    scores = G * T * T * 4
    return (5 * act                        # 2x input + 2x output blocks + h_ref scratch
            + 2 * per_layer_weight_bytes   # double-buffered per-layer weights
            + 2 * scores                   # score + prob f32 temporaries
            + 3 * G * T * dh * 4           # split q/k/v
            + 4 * act)                     # headroom: relayout temporaries, biases, ...


def attention_forward(seqs, params, last_g, last_b, num_heads,
                      causality=False, batch_tile=None, weight_buffers=None):
    """Runs the full Attention stack (num_att blocks + final layernorm) in ONE
    pallas_call.  `batch_tile` = sequences per grid step (GEMM batching);
    `weight_buffers` > 2 enables deeper weight pipelining (v5e, exposed weight DMA)."""
    B, T, K = seqs.shape
    num_layers = params["wq"].shape[0]
    if batch_tile is None:
        batch_tile = _default_batch_tile(B, T)
    assert B % batch_tile == 0, "batch must be divisible by batch_tile"
    assert K % num_heads == 0, "hidden size must be divisible by num_heads"
    M = batch_tile * T
    if batch_tile != B:
        assert M % 8 == 0, "batch_tile * seq_len must be a multiple of 8 (sublane tiling)"
    # NOTE: for lane-dense (unmasked) loads/stores K should be a multiple of 128;
    # smaller K still lowers correctly, just with masked partial vectors.

    dh = K // num_heads
    scale = 1.0 / math.sqrt(dh)

    # Fold the 1/sqrt(dh) query scale into wq/bq (free at trace time) and stream all
    # big matrices through the MXU in bf16 (accumulation stays f32 in the kernel).
    wdict = dict(params)
    wdict["wq"] = (params["wq"].astype(jnp.float32) * scale).astype(_MXU_DTYPE)
    wdict["bq"] = params["bq"].astype(jnp.float32) * scale
    for name in ("wkv", "wo", "w1", "w2"):
        wdict[name] = params[name].astype(_MXU_DTYPE)

    x2 = seqs.reshape(B * T, K)            # lane-contiguous 2-D activation slab
    weights = [wdict[name] for name in _WEIGHT_ORDER]

    def layer_spec(w):
        kwargs = {}
        if weight_buffers is not None and weight_buffers != 2 and w.shape[1] > 1:
            # Deeper buffering on the big matrices hides exposed weight DMA (v5e).
            kwargs["pipeline_mode"] = pl.Buffered(weight_buffers)
        return pl.BlockSpec((1,) + w.shape[1:], lambda b, l: (l, 0, 0), **kwargs)

    last_spec = pl.BlockSpec(last_g.shape, lambda b, l: (0, 0))
    act_spec = pl.BlockSpec((M, K), lambda b, l: (b, 0))

    per_layer_weight_bytes = sum(
        int(w.dtype.itemsize) * int(math.prod(w.shape[1:])) for w in weights)
    cp = {"dimension_semantics": ("parallel", "arbitrary")}
    est = _vmem_bytes_estimate(M, T, K, num_heads, per_layer_weight_bytes)
    if est > (32 << 20):
        # Explicit scoped-VMEM budget (v7x: 64 MiB physical — shrink batch_tile if the
        # estimate does not fit; v5e/v6e have 128 MiB physical).
        cp["vmem_limit_bytes"] = min(int(est), 127 << 20)

    kernel = functools.partial(_fused_stack_kernel, num_heads, T, causality)
    out2 = pl.pallas_call(
        kernel,
        out_shape=jax.ShapeDtypeStruct((B * T, K), seqs.dtype),
        grid=(B // batch_tile, num_layers),
        in_specs=[act_spec] + [layer_spec(w) for w in weights] + [last_spec, last_spec],
        out_specs=act_spec,
        scratch_shapes=[pltpu.VMEM((M, K), jnp.float32)],
        # Activation slab is read only at layer 0 and written only after the last
        # layer, so input and output can share one HBM buffer.
        input_output_aliases={0: 0},
        compiler_params=pltpu.CompilerParams(**cp),
    )(x2, *weights, last_g, last_b)
    return out2.reshape(B, T, K)


def init_params(key, num_att, K):
    """Deterministic synthetic parameters (not a checkpoint load), stacked per layer.
    Matmul weights are stored bf16 (MXU-native); biases / LayerNorm params stay f32."""
    L = num_att
    s = 1.0 / math.sqrt(K)
    key, *ks = jax.random.split(key, 14)

    def rnd(k, shape):
        return jax.random.normal(k, shape, jnp.float32)

    params = {
        "ln1_g": 1.0 + 0.1 * rnd(ks[0], (L, 1, K)),
        "ln1_b": 0.1 * rnd(ks[1], (L, 1, K)),
        "wq":    (s * rnd(ks[2], (L, K, K))).astype(_MXU_DTYPE),
        "bq":    jnp.zeros((L, 1, K), jnp.float32),
        "wkv":   (s * rnd(ks[3], (L, K, 2 * K))).astype(_MXU_DTYPE),   # [Wk | Wv] fused
        "bkv":   jnp.zeros((L, 1, 2 * K), jnp.float32),
        "wo":    (s * rnd(ks[4], (L, K, K))).astype(_MXU_DTYPE),
        "bo":    0.01 * rnd(ks[5], (L, 1, K)),
        "ln2_g": 1.0 + 0.1 * rnd(ks[6], (L, 1, K)),
        "ln2_b": 0.1 * rnd(ks[7], (L, 1, K)),
        "w1":    (s * rnd(ks[8], (L, K, K))).astype(_MXU_DTYPE),       # Conv1d(K,K,1) pre-transposed
        "b1":    0.01 * rnd(ks[9], (L, 1, K)),
        "w2":    (s * rnd(ks[10], (L, K, K))).astype(_MXU_DTYPE),
        "b2":    jnp.zeros((L, 1, K), jnp.float32),
    }
    last_g = 1.0 + 0.1 * rnd(ks[11], (1, K))
    last_b = 0.1 * rnd(ks[12], (1, K))
    return params, last_g, last_b


def _reference_forward(seqs, params, last_g, last_b, num_heads, causality):
    """Pure-JAX (XLA, f32) reference mirroring the PyTorch module, for validation.
    Uses the SAME (bf16-stored) weights, upcast to f32."""
    B, T, K = seqs.shape
    H = num_heads
    dh = K // H
    x = seqs.astype(jnp.float32)
    num_layers = params["wq"].shape[0]
    f32 = lambda a: a.astype(jnp.float32)
    for l in range(num_layers):
        q_in = _layernorm(x, params["ln1_g"][l], params["ln1_b"][l])
        q = q_in @ f32(params["wq"][l]) + params["bq"][l]
        kv = x @ f32(params["wkv"][l]) + params["bkv"][l]
        k, v = kv[..., :K], kv[..., K:]

        def heads(z):
            return z.reshape(B, T, H, dh).transpose(0, 2, 1, 3)

        qh, kh, vh = heads(q), heads(k), heads(v)
        s = jnp.einsum("bhqd,bhkd->bhqk", qh, kh) / math.sqrt(dh)
        if causality:
            causal = jnp.tril(jnp.ones((T, T), bool))
            s = jnp.where(causal, s, -1e30)
        p = jax.nn.softmax(s, axis=-1)
        o = jnp.einsum("bhqk,bhkd->bhqd", p, vh)
        attn = o.transpose(0, 2, 1, 3).reshape(B, T, K) @ f32(params["wo"][l]) + params["bo"][l]
        h_res = q_in + attn
        h2 = _layernorm(h_res, params["ln2_g"][l], params["ln2_b"][l])
        f = jax.nn.relu(h2 @ f32(params["w1"][l]) + params["b1"][l])
        f = f @ f32(params["w2"][l]) + params["b2"][l]
        x = h2 + f
    return _layernorm(x, last_g, last_b)


if __name__ == "__main__":
    B, T, K = 2, 16, 64
    NUM_ATT, NUM_HEADS = 2, 4

    key = jax.random.PRNGKey(0)
    key, xk = jax.random.split(key)
    seqs = jax.random.normal(xk, (B, T, K), jnp.float32)
    params, last_g, last_b = init_params(key, NUM_ATT, K)

    for causal in (False, True):
        ref = _reference_forward(seqs, params, last_g, last_b, NUM_HEADS, causal)
        ref_max = float(jnp.max(jnp.abs(ref)))
        # Tolerance accounts for bf16 MXU inputs + approx softmax reciprocal.
        tol = 2e-2 + 2e-2 * ref_max
        for bt_arg in (None, 1):      # exercise both the single-tile and the
            out = attention_forward(  # multi-tile ('parallel' batch axis) paths
                seqs, params, last_g, last_b, NUM_HEADS,
                causality=causal, batch_tile=bt_arg)
            out = jax.block_until_ready(out)
            assert out.shape == (B, T, K) and out.dtype == jnp.float32
            err = float(jnp.max(jnp.abs(out - ref)))
            assert err < tol, (
                f"kernel/reference mismatch (causal={causal}, batch_tile={bt_arg}): "
                f"{err} vs tol {tol}")

    print("KERNEL_OK")
</pallas_src>

<mosaic_0001>
module attributes {stable_mosaic.version = 11 : i64} {
  func.func @_fused_stack_kernel(%arg0: i32, %arg1: i32, %arg2: memref<32x64xf32, #tpu.memory_space<vmem>>, %arg3: memref<1x1x64xf32, #tpu.memory_space<vmem>>, %arg4: memref<1x1x64xf32, #tpu.memory_space<vmem>>, %arg5: memref<1x64x64xbf16, #tpu.memory_space<vmem>>, %arg6: memref<1x1x64xf32, #tpu.memory_space<vmem>>, %arg7: memref<1x64x128xbf16, #tpu.memory_space<vmem>>, %arg8: memref<1x1x128xf32, #tpu.memory_space<vmem>>, %arg9: memref<1x64x64xbf16, #tpu.memory_space<vmem>>, %arg10: memref<1x1x64xf32, #tpu.memory_space<vmem>>, %arg11: memref<1x1x64xf32, #tpu.memory_space<vmem>>, %arg12: memref<1x1x64xf32, #tpu.memory_space<vmem>>, %arg13: memref<1x64x64xbf16, #tpu.memory_space<vmem>>, %arg14: memref<1x1x64xf32, #tpu.memory_space<vmem>>, %arg15: memref<1x64x64xbf16, #tpu.memory_space<vmem>>, %arg16: memref<1x1x64xf32, #tpu.memory_space<vmem>>, %arg17: memref<1x64xf32, #tpu.memory_space<vmem>>, %arg18: memref<1x64xf32, #tpu.memory_space<vmem>>, %arg19: memref<32x64xf32, #tpu.memory_space<vmem>>, %arg20: memref<32x64xf32, #tpu.memory_space<vmem>>) attributes {dimension_semantics = [#tpu.dimension_semantics<parallel>, #tpu.dimension_semantics<arbitrary>], iteration_bounds = array<i64: 1, 2>, scalar_prefetch = 0 : i64, scratch_operands = 1 : i64, tpu.core_type = #tpu.core_type<tc>, window_params = [{transform_indices = @transform_0, window_bounds = array<i64: 32, 64>}, {transform_indices = @transform_1, window_bounds = array<i64: 1, 1, 64>}, {transform_indices = @transform_2, window_bounds = array<i64: 1, 1, 64>}, {transform_indices = @transform_3, window_bounds = array<i64: 1, 64, 64>}, {transform_indices = @transform_4, window_bounds = array<i64: 1, 1, 64>}, {transform_indices = @transform_5, window_bounds = array<i64: 1, 64, 128>}, {transform_indices = @transform_6, window_bounds = array<i64: 1, 1, 128>}, {transform_indices = @transform_7, window_bounds = array<i64: 1, 64, 64>}, {transform_indices = @transform_8, window_bounds = array<i64: 1, 1, 64>}, {transform_indices = @transform_9, window_bounds = array<i64: 1, 1, 64>}, {transform_indices = @transform_10, window_bounds = array<i64: 1, 1, 64>}, {transform_indices = @transform_11, window_bounds = array<i64: 1, 64, 64>}, {transform_indices = @transform_12, window_bounds = array<i64: 1, 1, 64>}, {transform_indices = @transform_13, window_bounds = array<i64: 1, 64, 64>}, {transform_indices = @transform_14, window_bounds = array<i64: 1, 1, 64>}, {pipeline_mode = #tpu.pipeline_mode<synchronous>, transform_indices = @transform_15, window_bounds = array<i64: 1, 64>}, {pipeline_mode = #tpu.pipeline_mode<synchronous>, transform_indices = @transform_16, window_bounds = array<i64: 1, 64>}, {transform_indices = @transform_17, window_bounds = array<i64: 32, 64>}]} {
    %c0_i32 = arith.constant 0 : i32
    %0 = arith.cmpi eq, %arg1, %c0_i32 : i32
    %1 = arith.extui %0 : i1 to i32
    %c0_i32_0 = arith.constant 0 : i32
    %2 = arith.cmpi ne, %1, %c0_i32_0 : i32
    scf.if %2 {
      %c0_66 = arith.constant 0 : index
      %c0_67 = arith.constant 0 : index
      %151 = vector.load %arg2[%c0_66, %c0_67] : memref<32x64xf32, #tpu.memory_space<vmem>>, vector<32x64xf32>
      %c0_68 = arith.constant 0 : index
      %c0_69 = arith.constant 0 : index
      %152 = vector.load %arg20[%c0_68, %c0_69] : memref<32x64xf32, #tpu.memory_space<vmem>>, vector<32x64xf32>
      tpu.vector_store %arg20[%c0_68, %c0_69], %151 {strides = array<i32>} : memref<32x64xf32, #tpu.memory_space<vmem>>, vector<32x64xf32>,
    } else {
    }
    %c0 = arith.constant 0 : index
    %c0_1 = arith.constant 0 : index
    %3 = vector.load %arg20[%c0, %c0_1] : memref<32x64xf32, #tpu.memory_space<vmem>>, vector<32x64xf32>
    %c0_2 = arith.constant 0 : index
    %c0_3 = arith.constant 0 : index
    %c0_4 = arith.constant 0 : index
    %4 = vector.load %arg3[%c0_2, %c0_3, %c0_4] : memref<1x1x64xf32, #tpu.memory_space<vmem>>, vector<1x1x64xf32>
    %5 = vector.shape_cast %4 : vector<1x1x64xf32> to vector<1x64xf32>
    %c0_5 = arith.constant 0 : index
    %c0_6 = arith.constant 0 : index
    %c0_7 = arith.constant 0 : index
    %6 = vector.load %arg4[%c0_5, %c0_6, %c0_7] : memref<1x1x64xf32, #tpu.memory_space<vmem>>, vector<1x1x64xf32>
    %7 = vector.shape_cast %6 : vector<1x1x64xf32> to vector<1x64xf32>
    %cst = arith.constant dense<0.000000e+00> : vector<32xf32>
    %8 = vector.multi_reduction <add>, %3, %cst [1] : vector<32x64xf32> to vector<32xf32>
    %9 = vector.shape_cast %8 : vector<32xf32> to vector<32x1xf32>
    %cst_8 = arith.constant 6.400000e+01 : f32
    %10 = vector.broadcast %cst_8 : f32 to vector<32x1xf32>
    %11 = arith.divf %9, %10 : vector<32x1xf32>
    %12 = vector.broadcast %11 : vector<32x1xf32> to vector<32x64xf32>
    %13 = arith.subf %3, %12 : vector<32x64xf32>
    %14 = arith.mulf %13, %13 : vector<32x64xf32>
    %cst_9 = arith.constant dense<0.000000e+00> : vector<32xf32>
    %15 = vector.multi_reduction <add>, %14, %cst_9 [1] : vector<32x64xf32> to vector<32xf32>
    %16 = vector.shape_cast %15 : vector<32xf32> to vector<32x1xf32>
    %cst_10 = arith.constant 6.400000e+01 : f32
    %17 = vector.broadcast %cst_10 : f32 to vector<32x1xf32>
    %18 = arith.divf %16, %17 : vector<32x1xf32>
    %cst_11 = arith.constant 9.99999993E-9 : f32
    %19 = vector.broadcast %cst_11 : f32 to vector<32x1xf32>
    %20 = arith.addf %18, %19 : vector<32x1xf32>
    %21 = math.rsqrt %20 : vector<32x1xf32>
    %22 = vector.broadcast %21 : vector<32x1xf32> to vector<32x64xf32>
    %23 = arith.mulf %13, %22 : vector<32x64xf32>
    %24 = vector.broadcast %5 : vector<1x64xf32> to vector<32x64xf32>
    %25 = arith.mulf %23, %24 : vector<32x64xf32>
    %26 = vector.broadcast %7 : vector<1x64xf32> to vector<32x64xf32>
    %27 = arith.addf %25, %26 : vector<32x64xf32>
    %28 = arith.truncf %27 : vector<32x64xf32> to vector<32x64xbf16>
    %c0_12 = arith.constant 0 : index
    %c0_13 = arith.constant 0 : index
    %c0_14 = arith.constant 0 : index
    %29 = vector.load %arg5[%c0_12, %c0_13, %c0_14] : memref<1x64x64xbf16, #tpu.memory_space<vmem>>, vector<1x64x64xbf16>
    %30 = vector.shape_cast %29 : vector<1x64x64xbf16> to vector<64x64xbf16>
    %cst_15 = arith.constant dense<0.000000e+00> : vector<32x64xf32>
    %31 = tpu.matmul %28, %30, %cst_15 {dimension_numbers = #tpu.dot_dimension_numbers<[1], [0], [0], [1], [0, 0, 1, 1], [], []>} : vector<32x64xbf16>, vector<64x64xbf16>, vector<32x64xf32> -> vector<32x64xf32>
    %c0_16 = arith.constant 0 : index
    %c0_17 = arith.constant 0 : index
    %c0_18 = arith.constant 0 : index
    %32 = vector.load %arg6[%c0_16, %c0_17, %c0_18] : memref<1x1x64xf32, #tpu.memory_space<vmem>>, vector<1x1x64xf32>
    %33 = vector.shape_cast %32 : vector<1x1x64xf32> to vector<1x64xf32>
    %34 = vector.broadcast %33 : vector<1x64xf32> to vector<32x64xf32>
    %35 = arith.addf %31, %34 : vector<32x64xf32>
    %36 = arith.truncf %3 : vector<32x64xf32> to vector<32x64xbf16>
    %c0_19 = arith.constant 0 : index
    %c0_20 = arith.constant 0 : index
    %c0_21 = arith.constant 0 : index
    %37 = vector.load %arg7[%c0_19, %c0_20, %c0_21] : memref<1x64x128xbf16, #tpu.memory_space<vmem>>, vector<1x64x128xbf16>
    %38 = vector.shape_cast %37 : vector<1x64x128xbf16> to vector<64x128xbf16>
    %cst_22 = arith.constant dense<0.000000e+00> : vector<32x128xf32>
    %39 = tpu.matmul %36, %38, %cst_22 {dimension_numbers = #tpu.dot_dimension_numbers<[1], [0], [0], [1], [0, 0, 1, 1], [], []>} : vector<32x64xbf16>, vector<64x128xbf16>, vector<32x128xf32> -> vector<32x128xf32>
    %c0_23 = arith.constant 0 : index
    %c0_24 = arith.constant 0 : index
    %c0_25 = arith.constant 0 : index
    %40 = vector.load %arg8[%c0_23, %c0_24, %c0_25] : memref<1x1x128xf32, #tpu.memory_space<vmem>>, vector<1x1x128xf32>
    %41 = vector.shape_cast %40 : vector<1x1x128xf32> to vector<1x128xf32>
    %42 = vector.broadcast %41 : vector<1x128xf32> to vector<32x128xf32>
    %43 = arith.addf %39, %42 : vector<32x128xf32>
    %44 = arith.truncf %35 : vector<32x64xf32> to vector<32x64xbf16>
    %45 = arith.truncf %43 : vector<32x128xf32> to vector<32x128xbf16>
    %46 = vector.extract_strided_slice %44 {offsets = [0, 0], sizes = [32, 16], strides = [1, 1]} : vector<32x64xbf16> to vector<32x16xbf16>
    %47 = vector.shape_cast %46 : vector<32x16xbf16> to vector<2x16x16xbf16>
    %48 = vector.extract_strided_slice %44 {offsets = [0, 16], sizes = [32, 16], strides = [1, 1]} : vector<32x64xbf16> to vector<32x16xbf16>
    %49 = vector.shape_cast %48 : vector<32x16xbf16> to vector<2x16x16xbf16>
    %50 = vector.extract_strided_slice %44 {offsets = [0, 32], sizes = [32, 16], strides = [1, 1]} : vector<32x64xbf16> to vector<32x16xbf16>
    %51 = vector.shape_cast %50 : vector<32x16xbf16> to vector<2x16x16xbf16>
    %52 = vector.extract_strided_slice %44 {offsets = [0, 48], sizes = [32, 16], strides = [1, 1]} : vector<32x64xbf16> to vector<32x16xbf16>
    %53 = vector.shape_cast %52 : vector<32x16xbf16> to vector<2x16x16xbf16>
    %54 = tpu.concatenate %47, %49, %51, %53 in 0 : vector<2x16x16xbf16>, vector<2x16x16xbf16>, vector<2x16x16xbf16>, vector<2x16x16xbf16> -> vector<8x16x16xbf16>
    %55 = vector.extract_strided_slice %45 {offsets = [0, 0], sizes = [32, 16], strides = [1, 1]} : vector<32x128xbf16> to vector<32x16xbf16>
    %56 = vector.shape_cast %55 : vector<32x16xbf16> to vector<2x16x16xbf16>
    %57 = vector.extract_strided_slice %45 {offsets = [0, 16], sizes = [32, 16], strides = [1, 1]} : vector<32x128xbf16> to vector<32x16xbf16>
    %58 = vector.shape_cast %57 : vector<32x16xbf16> to vector<2x16x16xbf16>
    %59 = vector.extract_strided_slice %45 {offsets = [0, 32], sizes = [32, 16], strides = [1, 1]} : vector<32x128xbf16> to vector<32x16xbf16>
    %60 = vector.shape_cast %59 : vector<32x16xbf16> to vector<2x16x16xbf16>
    %61 = vector.extract_strided_slice %45 {offsets = [0, 48], sizes = [32, 16], strides = [1, 1]} : vector<32x128xbf16> to vector<32x16xbf16>
    %62 = vector.shape_cast %61 : vector<32x16xbf16> to vector<2x16x16xbf16>
    %63 = tpu.concatenate %56, %58, %60, %62 in 0 : vector<2x16x16xbf16>, vector<2x16x16xbf16>, vector<2x16x16xbf16>, vector<2x16x16xbf16> -> vector<8x16x16xbf16>
    %64 = vector.extract_strided_slice %45 {offsets = [0, 64], sizes = [32, 16], strides = [1, 1]} : vector<32x128xbf16> to vector<32x16xbf16>
    %65 = vector.shape_cast %64 : vector<32x16xbf16> to vector<2x16x16xbf16>
    %66 = vector.extract_strided_slice %45 {offsets = [0, 80], sizes = [32, 16], strides = [1, 1]} : vector<32x128xbf16> to vector<32x16xbf16>
    %67 = vector.shape_cast %66 : vector<32x16xbf16> to vector<2x16x16xbf16>
    %68 = vector.extract_strided_slice %45 {offsets = [0, 96], sizes = [32, 16], strides = [1, 1]} : vector<32x128xbf16> to vector<32x16xbf16>
    %69 = vector.shape_cast %68 : vector<32x16xbf16> to vector<2x16x16xbf16>
    %70 = vector.extract_strided_slice %45 {offsets = [0, 112], sizes = [32, 16], strides = [1, 1]} : vector<32x128xbf16> to vector<32x16xbf16>
    %71 = vector.shape_cast %70 : vector<32x16xbf16> to vector<2x16x16xbf16>
    %72 = tpu.concatenate %65, %67, %69, %71 in 0 : vector<2x16x16xbf16>, vector<2x16x16xbf16>, vector<2x16x16xbf16>, vector<2x16x16xbf16> -> vector<8x16x16xbf16>
    "tpu.trace_start"() <{level = 10 : i32, message = "gqd,gkd->gqk"}> : () -> ()
    %cst_26 = arith.constant dense<0.000000e+00> : vector<8x16x16xf32>
    %73 = tpu.matmul %54, %63, %cst_26 {dimension_numbers = #tpu.dot_dimension_numbers<[2], [2], [1], [1], [0, 0, 0, 1, 1, 1], [0], [0]>} : vector<8x16x16xbf16>, vector<8x16x16xbf16>, vector<8x16x16xf32> -> vector<8x16x16xf32>
    "tpu.trace_stop"() : () -> ()
    %cst_27 = arith.constant dense<0xFF800000> : vector<8x16xf32>
    %74 = vector.multi_reduction <maximumf>, %73, %cst_27 [2] : vector<8x16x16xf32> to vector<8x16xf32>
    %75 = vector.shape_cast %74 : vector<8x16xf32> to vector<8x16x1xf32>
    %76 = vector.broadcast %75 : vector<8x16x1xf32> to vector<8x16x16xf32>
    %77 = arith.subf %73, %76 : vector<8x16x16xf32>
    %78 = math.exp %77 : vector<8x16x16xf32>
    %cst_28 = arith.constant dense<0.000000e+00> : vector<8x16xf32>
    %79 = vector.multi_reduction <add>, %78, %cst_28 [2] : vector<8x16x16xf32> to vector<8x16xf32>
    %80 = vector.shape_cast %79 : vector<8x16xf32> to vector<8x16x1xf32>
    %81 = tpu.reciprocal %80 {approx = true} : vector<8x16x1xf32> -> vector<8x16x1xf32>
    %82 = vector.broadcast %81 : vector<8x16x1xf32> to vector<8x16x16xf32>
    %83 = arith.mulf %78, %82 : vector<8x16x16xf32>
    %84 = arith.truncf %83 : vector<8x16x16xf32> to vector<8x16x16xbf16>
    "tpu.trace_start"() <{level = 10 : i32, message = "gqk,gkd->gqd"}> : () -> ()
    %cst_29 = arith.constant dense<0.000000e+00> : vector<8x16x16xf32>
    %85 = tpu.matmul %84, %72, %cst_29 {dimension_numbers = #tpu.dot_dimension_numbers<[2], [1], [1], [2], [0, 0, 0, 1, 1, 2], [0], [0]>} : vector<8x16x16xbf16>, vector<8x16x16xbf16>, vector<8x16x16xf32> -> vector<8x16x16xf32>
    "tpu.trace_stop"() : () -> ()
    %86 = vector.extract_strided_slice %85 {offsets = [0, 0, 0], sizes = [2, 16, 16], strides = [1, 1, 1]} : vector<8x16x16xf32> to vector<2x16x16xf32>
    %87 = vector.shape_cast %86 : vector<2x16x16xf32> to vector<32x16xf32>
    %88 = vector.extract_strided_slice %85 {offsets = [2, 0, 0], sizes = [2, 16, 16], strides = [1, 1, 1]} : vector<8x16x16xf32> to vector<2x16x16xf32>
    %89 = vector.shape_cast %88 : vector<2x16x16xf32> to vector<32x16xf32>
    %90 = vector.extract_strided_slice %85 {offsets = [4, 0, 0], sizes = [2, 16, 16], strides = [1, 1, 1]} : vector<8x16x16xf32> to vector<2x16x16xf32>
    %91 = vector.shape_cast %90 : vector<2x16x16xf32> to vector<32x16xf32>
    %92 = vector.extract_strided_slice %85 {offsets = [6, 0, 0], sizes = [2, 16, 16], strides = [1, 1, 1]} : vector<8x16x16xf32> to vector<2x16x16xf32>
    %93 = vector.shape_cast %92 : vector<2x16x16xf32> to vector<32x16xf32>
    %94 = tpu.concatenate %87, %89, %91, %93 in 1 : vector<32x16xf32>, vector<32x16xf32>, vector<32x16xf32>, vector<32x16xf32> -> vector<32x64xf32>
    %95 = arith.truncf %94 : vector<32x64xf32> to vector<32x64xbf16>
    %c0_30 = arith.constant 0 : index
    %c0_31 = arith.constant 0 : index
    %c0_32 = arith.constant 0 : index
    %96 = vector.load %arg9[%c0_30, %c0_31, %c0_32] : memref<1x64x64xbf16, #tpu.memory_space<vmem>>, vector<1x64x64xbf16>
    %97 = vector.shape_cast %96 : vector<1x64x64xbf16> to vector<64x64xbf16>
    %cst_33 = arith.constant dense<0.000000e+00> : vector<32x64xf32>
    %98 = tpu.matmul %95, %97, %cst_33 {dimension_numbers = #tpu.dot_dimension_numbers<[1], [0], [0], [1], [0, 0, 1, 1], [], []>} : vector<32x64xbf16>, vector<64x64xbf16>, vector<32x64xf32> -> vector<32x64xf32>
    %c0_34 = arith.constant 0 : index
    %c0_35 = arith.constant 0 : index
    %c0_36 = arith.constant 0 : index
    %99 = vector.load %arg10[%c0_34, %c0_35, %c0_36] : memref<1x1x64xf32, #tpu.memory_space<vmem>>, vector<1x1x64xf32>
    %100 = vector.shape_cast %99 : vector<1x1x64xf32> to vector<1x64xf32>
    %101 = vector.broadcast %100 : vector<1x64xf32> to vector<32x64xf32>
    %102 = arith.addf %98, %101 : vector<32x64xf32>
    %103 = arith.addf %27, %102 : vector<32x64xf32>
    %c0_37 = arith.constant 0 : index
    %c0_38 = arith.constant 0 : index
    %c0_39 = arith.constant 0 : index
    %104 = vector.load %arg11[%c0_37, %c0_38, %c0_39] : memref<1x1x64xf32, #tpu.memory_space<vmem>>, vector<1x1x64xf32>
    %105 = vector.shape_cast %104 : vector<1x1x64xf32> to vector<1x64xf32>
    %c0_40 = arith.constant 0 : index
    %c0_41 = arith.constant 0 : index
    %c0_42 = arith.constant 0 : index
    %106 = vector.load %arg12[%c0_40, %c0_41, %c0_42] : memref<1x1x64xf32, #tpu.memory_space<vmem>>, vector<1x1x64xf32>
    %107 = vector.shape_cast %106 : vector<1x1x64xf32> to vector<1x64xf32>
    %cst_43 = arith.constant dense<0.000000e+00> : vector<32xf32>
    %108 = vector.multi_reduction <add>, %103, %cst_43 [1] : vector<32x64xf32> to vector<32xf32>
    %109 = vector.shape_cast %108 : vector<32xf32> to vector<32x1xf32>
    %cst_44 = arith.constant 6.400000e+01 : f32
    %110 = vector.broadcast %cst_44 : f32 to vector<32x1xf32>
    %111 = arith.divf %109, %110 : vector<32x1xf32>
    %112 = vector.broadcast %111 : vector<32x1xf32> to vector<32x64xf32>
    %113 = arith.subf %103, %112 : vector<32x64xf32>
    %114 = arith.mulf %113, %113 : vector<32x64xf32>
    %cst_45 = arith.constant dense<0.000000e+00> : vector<32xf32>
    %115 = vector.multi_reduction <add>, %114, %cst_45 [1] : vector<32x64xf32> to vector<32xf32>
    %116 = vector.shape_cast %115 : vector<32xf32> to vector<32x1xf32>
    %cst_46 = arith.constant 6.400000e+01 : f32
    %117 = vector.broadcast %cst_46 : f32 to vector<32x1xf32>
    %118 = arith.divf %116, %117 : vector<32x1xf32>
    %cst_47 = arith.constant 9.99999993E-9 : f32
    %119 = vector.broadcast %cst_47 : f32 to vector<32x1xf32>
    %120 = arith.addf %118, %119 : vector<32x1xf32>
    %121 = math.rsqrt %120 : vector<32x1xf32>
    %122 = vector.broadcast %121 : vector<32x1xf32> to vector<32x64xf32>
    %123 = arith.mulf %113, %122 : vector<32x64xf32>
    %124 = vector.broadcast %105 : vector<1x64xf32> to vector<32x64xf32>
    %125 = arith.mulf %123, %124 : vector<32x64xf32>
    %126 = vector.broadcast %107 : vector<1x64xf32> to vector<32x64xf32>
    %127 = arith.addf %125, %126 : vector<32x64xf32>
    %128 = arith.truncf %127 : vector<32x64xf32> to vector<32x64xbf16>
    %c0_48 = arith.constant 0 : index
    %c0_49 = arith.constant 0 : index
    %c0_50 = arith.constant 0 : index
    %129 = vector.load %arg13[%c0_48, %c0_49, %c0_50] : memref<1x64x64xbf16, #tpu.memory_space<vmem>>, vector<1x64x64xbf16>
    %130 = vector.shape_cast %129 : vector<1x64x64xbf16> to vector<64x64xbf16>
    %cst_51 = arith.constant dense<0.000000e+00> : vector<32x64xf32>
    %131 = tpu.matmul %128, %130, %cst_51 {dimension_numbers = #tpu.dot_dimension_numbers<[1], [0], [0], [1], [0, 0, 1, 1], [], []>} : vector<32x64xbf16>, vector<64x64xbf16>, vector<32x64xf32> -> vector<32x64xf32>
    %c0_52 = arith.constant 0 : index
    %c0_53 = arith.constant 0 : index
    %c0_54 = arith.constant 0 : index
    %132 = vector.load %arg14[%c0_52, %c0_53, %c0_54] : memref<1x1x64xf32, #tpu.memory_space<vmem>>, vector<1x1x64xf32>
    %133 = vector.shape_cast %132 : vector<1x1x64xf32> to vector<1x64xf32>
    %134 = vector.broadcast %133 : vector<1x64xf32> to vector<32x64xf32>
    %135 = arith.addf %131, %134 : vector<32x64xf32>
    %cst_55 = arith.constant 0.000000e+00 : f32
    %136 = vector.broadcast %cst_55 : f32 to vector<32x64xf32>
    %137 = arith.maximumf %135, %136 : vector<32x64xf32>
    %138 = arith.truncf %137 : vector<32x64xf32> to vector<32x64xbf16>
    %c0_56 = arith.constant 0 : index
    %c0_57 = arith.constant 0 : index
    %c0_58 = arith.constant 0 : index
    %139 = vector.load %arg15[%c0_56, %c0_57, %c0_58] : memref<1x64x64xbf16, #tpu.memory_space<vmem>>, vector<1x64x64xbf16>
    %140 = vector.shape_cast %139 : vector<1x64x64xbf16> to vector<64x64xbf16>
    %cst_59 = arith.constant dense<0.000000e+00> : vector<32x64xf32>
    %141 = tpu.matmul %138, %140, %cst_59 {dimension_numbers = #tpu.dot_dimension_numbers<[1], [0], [0], [1], [0, 0, 1, 1], [], []>} : vector<32x64xbf16>, vector<64x64xbf16>, vector<32x64xf32> -> vector<32x64xf32>
    %c0_60 = arith.constant 0 : index
    %c0_61 = arith.constant 0 : index
    %c0_62 = arith.constant 0 : index
    %142 = vector.load %arg16[%c0_60, %c0_61, %c0_62] : memref<1x1x64xf32, #tpu.memory_space<vmem>>, vector<1x1x64xf32>
    %143 = vector.shape_cast %142 : vector<1x1x64xf32> to vector<1x64xf32>
    %144 = vector.broadcast %143 : vector<1x64xf32> to vector<32x64xf32>
    %145 = arith.addf %141, %144 : vector<32x64xf32>
    %146 = arith.addf %127, %145 : vector<32x64xf32>
    %c0_63 = arith.constant 0 : index
    %c0_64 = arith.constant 0 : index
    %147 = vector.load %arg20[%c0_63, %c0_64] : memref<32x64xf32, #tpu.memory_space<vmem>>, vector<32x64xf32>
    tpu.vector_store %arg20[%c0_63, %c0_64], %146 {strides = array<i32>} : memref<32x64xf32, #tpu.memory_space<vmem>>, vector<32x64xf32>,
    %c1_i32 = arith.constant 1 : i32
    %148 = arith.cmpi eq, %arg1, %c1_i32 : i32
    %149 = arith.extui %148 : i1 to i32
    %c0_i32_65 = arith.constant 0 : i32
    %150 = arith.cmpi ne, %149, %c0_i32_65 : i32
    scf.if %150 {
      %c0_66 = arith.constant 0 : index
      %c0_67 = arith.constant 0 : index
      %151 = vector.load %arg17[%c0_66, %c0_67] : memref<1x64xf32, #tpu.memory_space<vmem>>, vector<1x64xf32>
      %c0_68 = arith.constant 0 : index
      %c0_69 = arith.constant 0 : index
      %152 = vector.load %arg18[%c0_68, %c0_69] : memref<1x64xf32, #tpu.memory_space<vmem>>, vector<1x64xf32>
      %cst_70 = arith.constant dense<0.000000e+00> : vector<32xf32>
      %153 = vector.multi_reduction <add>, %146, %cst_70 [1] : vector<32x64xf32> to vector<32xf32>
      %154 = vector.shape_cast %153 : vector<32xf32> to vector<32x1xf32>
      %cst_71 = arith.constant 6.400000e+01 : f32
      %155 = vector.broadcast %cst_71 : f32 to vector<32x1xf32>
      %156 = arith.divf %154, %155 : vector<32x1xf32>
      %157 = vector.broadcast %156 : vector<32x1xf32> to vector<32x64xf32>
      %158 = arith.subf %146, %157 : vector<32x64xf32>
      %159 = arith.mulf %158, %158 : vector<32x64xf32>
      %cst_72 = arith.constant dense<0.000000e+00> : vector<32xf32>
      %160 = vector.multi_reduction <add>, %159, %cst_72 [1] : vector<32x64xf32> to vector<32xf32>
      %161 = vector.shape_cast %160 : vector<32xf32> to vector<32x1xf32>
      %cst_73 = arith.constant 6.400000e+01 : f32
      %162 = vector.broadcast %cst_73 : f32 to vector<32x1xf32>
      %163 = arith.divf %161, %162 : vector<32x1xf32>
      %cst_74 = arith.constant 9.99999993E-9 : f32
      %164 = vector.broadcast %cst_74 : f32 to vector<32x1xf32>
      %165 = arith.addf %163, %164 : vector<32x1xf32>
      %166 = math.rsqrt %165 : vector<32x1xf32>
      %167 = vector.broadcast %166 : vector<32x1xf32> to vector<32x64xf32>
      %168 = arith.mulf %158, %167 : vector<32x64xf32>
      %169 = vector.broadcast %151 : vector<1x64xf32> to vector<32x64xf32>
      %170 = arith.mulf %168, %169 : vector<32x64xf32>
      %171 = vector.broadcast %152 : vector<1x64xf32> to vector<32x64xf32>
      %172 = arith.addf %170, %171 : vector<32x64xf32>
      %c0_75 = arith.constant 0 : index
      %c0_76 = arith.constant 0 : index
      %173 = vector.load %arg19[%c0_75, %c0_76] : memref<32x64xf32, #tpu.memory_space<vmem>>, vector<32x64xf32>
      tpu.vector_store %arg19[%c0_75, %c0_76], %172 {strides = array<i32>} : memref<32x64xf32, #tpu.memory_space<vmem>>, vector<32x64xf32>,
    } else {
    }
    return
  }
  func.func @transform_0(%arg0: i32, %arg1: i32) -> (i32, i32) {
    %c0_i32 = arith.constant 0 : i32
    %c0_i32_0 = arith.constant 0 : i32
    return %arg0, %c0_i32 : i32, i32
  }
  func.func @transform_1(%arg0: i32, %arg1: i32) -> (i32, i32, i32) {
    %c0_i32 = arith.constant 0 : i32
    %c0_i32_0 = arith.constant 0 : i32
    %c0_i32_1 = arith.constant 0 : i32
    return %arg1, %c0_i32, %c0_i32_0 : i32, i32, i32
  }
  func.func @transform_2(%arg0: i32, %arg1: i32) -> (i32, i32, i32) {
    %c0_i32 = arith.constant 0 : i32
    %c0_i32_0 = arith.constant 0 : i32
    %c0_i32_1 = arith.constant 0 : i32
    return %arg1, %c0_i32, %c0_i32_0 : i32, i32, i32
  }
  func.func @transform_3(%arg0: i32, %arg1: i32) -> (i32, i32, i32) {
    %c0_i32 = arith.constant 0 : i32
    %c0_i32_0 = arith.constant 0 : i32
    %c0_i32_1 = arith.constant 0 : i32
    return %arg1, %c0_i32, %c0_i32_0 : i32, i32, i32
  }
  func.func @transform_4(%arg0: i32, %arg1: i32) -> (i32, i32, i32) {
    %c0_i32 = arith.constant 0 : i32
    %c0_i32_0 = arith.constant 0 : i32
    %c0_i32_1 = arith.constant 0 : i32
    return %arg1, %c0_i32, %c0_i32_0 : i32, i32, i32
  }
  func.func @transform_5(%arg0: i32, %arg1: i32) -> (i32, i32, i32) {
    %c0_i32 = arith.constant 0 : i32
    %c0_i32_0 = arith.constant 0 : i32
    %c0_i32_1 = arith.constant 0 : i32
    return %arg1, %c0_i32, %c0_i32_0 : i32, i32, i32
  }
  func.func @transform_6(%arg0: i32, %arg1: i32) -> (i32, i32, i32) {
    %c0_i32 = arith.constant 0 : i32
    %c0_i32_0 = arith.constant 0 : i32
    %c0_i32_1 = arith.constant 0 : i32
    return %arg1, %c0_i32, %c0_i32_0 : i32, i32, i32
  }
  func.func @transform_7(%arg0: i32, %arg1: i32) -> (i32, i32, i32) {
    %c0_i32 = arith.constant 0 : i32
    %c0_i32_0 = arith.constant 0 : i32
    %c0_i32_1 = arith.constant 0 : i32
    return %arg1, %c0_i32, %c0_i32_0 : i32, i32, i32
  }
  func.func @transform_8(%arg0: i32, %arg1: i32) -> (i32, i32, i32) {
    %c0_i32 = arith.constant 0 : i32
    %c0_i32_0 = arith.constant 0 : i32
    %c0_i32_1 = arith.constant 0 : i32
    return %arg1, %c0_i32, %c0_i32_0 : i32, i32, i32
  }
  func.func @transform_9(%arg0: i32, %arg1: i32) -> (i32, i32, i32) {
    %c0_i32 = arith.constant 0 : i32
    %c0_i32_0 = arith.constant 0 : i32
    %c0_i32_1 = arith.constant 0 : i32
    return %arg1, %c0_i32, %c0_i32_0 : i32, i32, i32
  }
  func.func @transform_10(%arg0: i32, %arg1: i32) -> (i32, i32, i32) {
    %c0_i32 = arith.constant 0 : i32
    %c0_i32_0 = arith.constant 0 : i32
    %c0_i32_1 = arith.constant 0 : i32
    return %arg1, %c0_i32, %c0_i32_0 : i32, i32, i32
  }
  func.func @transform_11(%arg0: i32, %arg1: i32) -> (i32, i32, i32) {
    %c0_i32 = arith.constant 0 : i32
    %c0_i32_0 = arith.constant 0 : i32
    %c0_i32_1 = arith.constant 0 : i32
    return %arg1, %c0_i32, %c0_i32_0 : i32, i32, i32
  }
  func.func @transform_12(%arg0: i32, %arg1: i32) -> (i32, i32, i32) {
    %c0_i32 = arith.constant 0 : i32
    %c0_i32_0 = arith.constant 0 : i32
    %c0_i32_1 = arith.constant 0 : i32
    return %arg1, %c0_i32, %c0_i32_0 : i32, i32, i32
  }
  func.func @transform_13(%arg0: i32, %arg1: i32) -> (i32, i32, i32) {
    %c0_i32 = arith.constant 0 : i32
    %c0_i32_0 = arith.constant 0 : i32
    %c0_i32_1 = arith.constant 0 : i32
    return %arg1, %c0_i32, %c0_i32_0 : i32, i32, i32
  }
  func.func @transform_14(%arg0: i32, %arg1: i32) -> (i32, i32, i32) {
    %c0_i32 = arith.constant 0 : i32
    %c0_i32_0 = arith.constant 0 : i32
    %c0_i32_1 = arith.constant 0 : i32
    return %arg1, %c0_i32, %c0_i32_0 : i32, i32, i32
  }
  func.func @transform_15(%arg0: i32, %arg1: i32) -> (i32, i32) {
    %c0_i32 = arith.constant 0 : i32
    %c0_i32_0 = arith.constant 0 : i32
    %c0_i32_1 = arith.constant 0 : i32
    return %c0_i32, %c0_i32_0 : i32, i32
  }
  func.func @transform_16(%arg0: i32, %arg1: i32) -> (i32, i32) {
    %c0_i32 = arith.constant 0 : i32
    %c0_i32_0 = arith.constant 0 : i32
    %c0_i32_1 = arith.constant 0 : i32
    return %c0_i32, %c0_i32_0 : i32, i32
  }
  func.func @transform_17(%arg0: i32, %arg1: i32) -> (i32, i32) {
    %c0_i32 = arith.constant 0 : i32
    %c0_i32_0 = arith.constant 0 : i32
    return %arg0, %c0_i32 : i32, i32
  }
}

</mosaic_0001>

<bundles_post_ra>
// kernel: tpu_custom_call.1
= control target key start
LH: loop header
LB: loop body
LE: loop exit
PB: predicated region body
PF: predicated region fallthrough
CT: control target
= control target key end

     0   :  { %s4176_s0 = inlined_call_operand.hbm [shape: f32[32,64], index: 0, kind: input, shape index: {}, may-alias: {0,17}]   ;;  %s4177_s1 = inlined_call_operand.vmem [shape: f32[2,1,64], index: 1, kind: input, shape index: {}]   ;;  %s4178_s2 = inlined_call_operand.hbm [shape: f32[2,1,64], index: 2, kind: input, shape index: {}]   ;;  %s4179_s3 = inlined_call_operand.vmem [shape: bf16[2,64,64], index: 3, kind: input, shape index: {}]   ;;  %s4180_s4 = inlined_call_operand.hbm [shape: f32[2,1,64], index: 4, kind: input, shape index: {}]   ;;  %s4181_s5 = inlined_call_operand.hbm [shape: bf16[2,64,128], index: 5, kind: input, shape index: {}]   ;;  %s4182_s6 = inlined_call_operand.vmem [shape: f32[2,1,128], index: 6, kind: input, shape index: {}]   ;;  %s4183_s7 = inlined_call_operand.hbm [shape: bf16[2,64,64], index: 7, kind: input, shape index: {}]   ;;  %s4184_s8 = inlined_call_operand.vmem [shape: f32[2,1,64], index: 8, kind: input, shape index: {}]   ;;  %s4185_s9 = inlined_call_operand.vmem [shape: f32[2,1,64], index: 9, kind: input, shape index: {}]   ;;  %s4186_s10 = inlined_call_operand.hbm [shape: f32[2,1,64], index: 10, kind: input, shape index: {}]   ;;  %s4187_s11 = inlined_call_operand.hbm [shape: bf16[2,64,64], index: 11, kind: input, shape index: {}]   ;;  %s4188_s12 = inlined_call_operand.vmem [shape: f32[2,1,64], index: 12, kind: input, shape index: {}]   ;;  %s4189_s13 = inlined_call_operand.hbm [shape: bf16[2,64,64], index: 13, kind: input, shape index: {}]   ;;  %s4190_s14 = inlined_call_operand.vmem [shape: f32[2,1,64], index: 14, kind: input, shape index: {}]   ;;  %s4191_s15 = inlined_call_operand.vmem [shape: f32[1,64], index: 15, kind: input, shape index: {}]   ;;  %s4192_s16 = inlined_call_operand.vmem [shape: f32[1,64], index: 16, kind: input, shape index: {}]   ;;  %s4193_s17 = inlined_call_operand.hbm [shape: f32[32,64], index: 17, kind: output, shape index: {}, may-alias: {0,17}]  }
   0x1   :  { %4205 = sst [smem:[#allocation29_spill]] %s4176_s0 }
   0x2   :  { %4206 = sst [smem:[#allocation30_spill]] %s4177_s1 }
   0x3   :  { %4207 = sst [smem:[#allocation31_spill]] %s4178_s2 }
   0x4   :  { %4208 = sst [smem:[#allocation32_spill]] %s4180_s4 }
   0x5   :  { %4209 = sst [smem:[#allocation33_spill]] %s4181_s5 }
   0x6   :  { %4210 = sst [smem:[#allocation34_spill]] %s4183_s7 }
   0x7   :  { %4211 = sst [smem:[#allocation35_spill]] %s4185_s9 }
   0x8   :  { %4212 = sst [smem:[#allocation36_spill]] %s4186_s10 }
   0x9   :  { %4213 = sst [smem:[#allocation37_spill]] %s4187_s11 }
   0xa   :  { %4214 = sst [smem:[#allocation38_spill]] %s4188_s12 }
   0xb   :  { %4215 = sst [smem:[#allocation39_spill]] %s4189_s13 }
   0xc   :  { %4216 = sst [smem:[#allocation40_spill]] %s4190_s14 }
   0xd   :  { %4217 = sst [smem:[#allocation41_spill]] %s4191_s15 }
   0xe   :  { %4218 = sst [smem:[#allocation42_spill]] %s4192_s16 }
   0xf   :  { %4219 = sst [smem:[#allocation43_spill]] %s4193_s17 }
  0x10   :  { %22 = vsyncpa [#allocation4], 0 }
  0x11   :  { %23 = vsyncpa [#allocation7], 0 }
  0x12   :  { %25 = vsyncpa [#allocation7 + $0x1], 0 }
  0x13   :  { %26 = vsyncpa [#allocation10], 0 }
  0x14   :  { %28 = vsyncpa [#allocation10 + $0x1], 0 }
  0x15   :  { %29 = vsyncpa [#allocation13], 0 }
  0x16   :  { %31 = vsyncpa [#allocation13 + $0x1], 0 }
  0x17   :  { %32 = vsyncpa [#allocation16], 0 }
  0x18   :  { %34 = vsyncpa [#allocation16 + $0x1], 0 }
  0x19   :  { %35 = vsyncpa [#allocation5], 0  ;;  %s3462_s24 = smov 0   ;;  %s3464_s25 = smov 0  }
  0x1a   :  { %s3466_s26 = smov 0   ;;  %s3468_s27 = smov 0  }
  0x1b   :  { %s3470_s28 = smov 0   ;;  %s3472_s29 = smov 0  }
  0x1c LB: > { %4220 = sst [smem:[#allocation24_spill]] %s3338_s25  ;;  %s50_s0 = sadd.s32 1, %s3350_s28  ;;  %s3354_s29 = sphi %s3472_s29, %s41_s29   ;;  %s3350_s28 = sphi %s3470_s28, %s4261_s28   ;;  %s3346_s27 = sphi %s3468_s27, %s4260_s27   ;;  %s3342_s26 = sphi %s3466_s26, %s4259_s26   ;;  %s3338_s25 = sphi %s3464_s25, %s4258_s25   ;;  %s3334_s24 = sphi %s3462_s24, %s4257_s24  }
  0x1d   : > { %4221 = sst [smem:[#allocation25_spill]] %s3342_s26  ;;  %s112_s30 = sadd.s32 1, %s3342_s26 }
  0x1e   : > { %4222 = sst [smem:[#allocation26_spill]] %s3350_s28  ;;  %p51_p0 = scmp.ge.s32.totalorder %s50_s0, 2 }
  0x1f   : > { %p119_p1 = scmp.ne.s32.totalorder %s3342_s26, %s3338_s25  ;;  %p120_p2 = scmp.eq.s32.totalorder %s3354_s29, 0 }
  0x20   : > { %s4263_s0 = smov (%p51_p0, %s50_s0), 0  ;;  %p2817_p4 = scmp.lt.s32.totalorder %s3354_s29, 2 }
  0x21   : > { %4223 = sst [smem:[#allocation27_spill]] %s4263_s0  ;;  %p3499_p3 = por %p120_p2, %p119_p1 }
  0x22   : > { %s109_s19 = ssub.s32 %s3350_s28, %s4263_s0  ;;  %s3507_s1 = sand.u32 1, %s3354_s29  }
  0x23   : > { %p110_p5 = scmp.eq.s32.totalorder %s109_s19, 0  ;;  %s3510_s20 = sand.u32 1, %s3342_s26  }
  0x24   : > { %s4225_s2 = sld [smem:[#allocation31_spill]]  ;;  %s561_s15 = scalar_lea.vmem [#allocation6], %s3510_s20 }
  0x25   : > { %s3517_s17 = scalar_select %p110_p5, %s3342_s26, %s112_s30  }
  0x26   : > { %s568_s0 = sshll.u32 %s561_s15, 4  ;;  %p3522_p6 = pnand %p2817_p4, %p3499_p3  ;;  %s569_s0 = int_to_ptr.vmem [resolvable:$true] %s568_s0 }
  0x27   : > { %4226 = sst [smem:[#allocation28_spill]] %s3517_s17  ;;  %s3527_s21 = sshll.u32 %s3510_s20, 5 }
  0x28   : > { %s4196_s30 = scalar_lea.sflag [#allocation7], %s3507_s1  ;;  %s3535_s22 = sshll.u32 %s3350_s28, 5 }
  0x29   : > { %s604_s15 = scalar_lea.vmem [#allocation9], %s3527_s21  ;;  %s4228_s5 = sld [smem:[#allocation33_spill]] }
  0x2a   : > { %s564_s23 = scalar_lea.hbm %s4225_s2, %s3350_s28  ;;  %s612_s18 = sshll.u32 %s604_s15, 4  ;;  %s613_s18 = int_to_ptr.vmem [resolvable:$true] %s612_s18 }
  0x2b   : > { %s566_s16 = sshll.u32 %s564_s23, 4  ;;  %s4229_s10 = sld [smem:[#allocation36_spill]]  ;;  %s567_s16 = int_to_ptr.hbm [resolvable:$true] %s566_s16 }
  0x2c   : > { %2797 = dma.hbm_to_vmem [thread:$0]  (!%p3522_p6), %s567_s16, 16, %s569_s0, %s4196_s30  }
  0x2d   : > { %s4198_s16 = scalar_lea.sflag [#allocation10], %s3507_s1  ;;  %s4199_s0 = smov 64  }
  0x2e   : > { %s4201_s30 = smov 4   ;;  %s3561_s9 = sadd.s32 4294967295, %s3354_s29  }
  0x2f   : > { %s609_s17 = scalar_lea.hbm %s4228_s5, %s3535_s22  ;;  %s665_s5 = scalar_lea.vmem [#allocation12], %s3510_s20 }
  0x30   : > { %s610_s26 = sshll.u32 %s609_s17, 4  ;;  %s672_s14 = sshll.u32 %s665_s5, 4  ;;  %s611_s26 = int_to_ptr.hbm [resolvable:$true] %s610_s26  ;;  %s673_s14 = int_to_ptr.vmem [resolvable:$true] %s672_s14 }
  0x31   : > { %2803 = dma.hbm_to_vmem [thread:$0]  (!%p3522_p6), %s611_s26, 512, %s613_s18, %s4198_s16, %s4199_s0, %s4199_s0, %s4201_s30  }
  0x32   : > { %s668_s23 = scalar_lea.hbm %s4229_s10, %s3350_s28  ;;  %s4197_s17 = scalar_lea.sflag [#allocation13], %s3507_s1 }
  0x33   : > { %s670_s12 = sshll.u32 %s668_s23, 4  ;;  %p125_p7 = scmp.ne.s32.totalorder %s3338_s25, %s3334_s24  ;;  %s671_s12 = int_to_ptr.hbm [resolvable:$true] %s670_s12 }
  0x34   : > { %2809 = dma.hbm_to_vmem [thread:$0]  (!%p3522_p6), %s671_s12, 16, %s673_s14, %s4197_s17  }
  0x35   : > { %p126_p8 = scmp.eq.s32.totalorder %s3561_s9, 0  ;;  %p2604_p9 = scmp.ge.s32.totalorder %s3354_s29, 1 }
  0x36   : > { %p516_p10 = scmp.lt.s32.totalorder %s3354_s29, 3  ;;  %s4232_s18 = sld [smem:[#allocation29_spill]] }
  0x37   : > { %p3570_p11 = por %p126_p8, %p125_p7  ;;  %s3358_s24 = smov [#allocation3]  }
  0x38   : > { %p3574_p12 = pnand %p2604_p9, %p516_p10  ;;  %s532_s15 = sshll.u32 %s3358_s24, 4  ;;  %s533_s15 = int_to_ptr.vmem [resolvable:$true] %s532_s15 }
  0x39   : > { %s4233_s4 = sld [smem:[#allocation32_spill]]  ;;  %s3359_s14 = smov 128  }
  0x3a   : > { %p2790_p13 = pneg %p3574_p12  ;;  %s586_s0 = scalar_lea.vmem [#allocation8], %s3510_s20 }
  0x3b   : > { %s593_s30 = sshll.u32 %s586_s0, 4  ;;  %s4234_s24 = scalar_lea.sflag [#allocation7], %s3507_s1  ;;  %s594_s30 = int_to_ptr.vmem [resolvable:$true] %s593_s30 }
  0x3c   : > { %s530_s2 = sshll.u32 %s4232_s18, 4  ;;  %p2791_p0 = pnand %p2790_p13, %p126_p8  ;;  %s531_s2 = int_to_ptr.hbm [resolvable:$true] %s530_s2 }
  0x3d   : > { %s3360_s18 = smov 8   ;;  %s4235_s7 = sld [smem:[#allocation34_spill]] }
  0x3e   : > { %2793 = dma.hbm_to_vmem [thread:$0]  (!%p2791_p0), %s531_s2, 512, %s533_s15, [#allocation4], %s3359_s14, %s3359_s14, %s3360_s18  }
  0x3f   : > { %s589_s16 = scalar_lea.hbm %s4233_s4, %s3350_s28  ;;  %s4236_s0 = smov 4  }
  0x40   : > { %s591_s12 = sshll.u32 %s589_s16, 4  ;;  %s632_s16 = scalar_lea.vmem [#allocation11], %s3527_s21  ;;  %s592_s12 = int_to_ptr.hbm [resolvable:$true] %s591_s12 }
  0x41   : > { %2800 = dma.hbm_to_vmem [thread:$0]  (!%p3522_p6), %s592_s12, 16, %s594_s30, %s4234_s24  }
  0x42   : > { %s640_s10 = sshll.u32 %s632_s16, 4  ;;  %s4237_s2 = smov 64   ;;  %s641_s10 = int_to_ptr.vmem [resolvable:$true] %s640_s10 }
  0x43   : > { %s637_s4 = scalar_lea.hbm %s4235_s7, %s3535_s22  ;;  %s4238_s15 = scalar_lea.sflag [#allocation10], %s3507_s1 }
  0x44   : > { %s638_s28 = sshll.u32 %s637_s4, 4  ;;  %s4239_s11 = sld [smem:[#allocation37_spill]]  ;;  %s639_s28 = int_to_ptr.hbm [resolvable:$true] %s638_s28 }
  0x45   : > { %2806 = dma.hbm_to_vmem [thread:$0]  (!%p3522_p6), %s639_s28, 512, %s641_s10, %s4238_s15, %s4237_s2, %s4237_s2, %s4236_s0  }
  0x46   : > { %s683_s18 = scalar_lea.vmem [#allocation14], %s3527_s21  ;;  %s4240_s4 = scalar_lea.sflag [#allocation13], %s3507_s1 }
  0x47   : > { %s691_s24 = sshll.u32 %s683_s18, 4  ;;  %s4241_s13 = sld [smem:[#allocation39_spill]]  ;;  %s692_s24 = int_to_ptr.vmem [resolvable:$true] %s691_s24 }
  0x48   : > { %s711_s28 = scalar_lea.vmem [#allocation15], %s3527_s21  ;;  %s708_s14 = scalar_lea.sflag [#allocation16], %s3510_s20 }
  0x49   : > { %s719_s15 = sshll.u32 %s711_s28, 4  ;;  %s720_s15 = int_to_ptr.vmem [resolvable:$true] %s719_s15 }
  0x4a   : > { %s688_s12 = scalar_lea.hbm %s4239_s11, %s3535_s22 }
  0x4b   : > { %s689_s17 = sshll.u32 %s688_s12, 4  ;;  %737 = sbr.rel (%p3574_p12) target bundleno = 2425 (0x979), region = 88  ;;  %s690_s17 = int_to_ptr.hbm [resolvable:$true] %s689_s17 }
  0x4c   : > { %2812 = dma.hbm_to_vmem [thread:$0]  (!%p3522_p6), %s690_s17, 512, %s692_s24, %s4240_s4, %s4237_s2, %s4237_s2, %s4236_s0  }
  0x4d   : > { %s716_s7 = scalar_lea.hbm %s4241_s13, %s3535_s22 }
  0x4e   : > { %s717_s10 = sshll.u32 %s716_s7, 4  ;;  %s718_s10 = int_to_ptr.hbm [resolvable:$true] %s717_s10 }
  0x4f   : > { %2815 = dma.hbm_to_vmem [thread:$0]  (!%p3522_p6), %s718_s10, 512, %s720_s15, %s708_s14, %s4237_s2, %s4237_s2, %s4236_s0  }
  0x50   : > { %3309 = dma.done.wait (%p126_p8), [#allocation4], 512  }
  0x51   : > { %3311 = vsyncadd (%p126_p8), [#allocation4], 4294966784  ;;  %s744_s7 = sand.u32 1, %s3561_s9   ;;  %s3637_s1 = sand.u32 1, %s3338_s25  }
  0x52   : > { %s745_s20 = scalar_lea.sflag [#allocation7], %s744_s7 }
  0x53   : > { %3313 = dma.done.wait (%p3570_p11), %s745_s20, 32  }
  0x54   : > { %3315 = vsyncadd (%p3570_p11), %s745_s20, 4294967264  ;;  %s2621_s21 = sshll.u32 %s3637_s1, 5  ;;  %s763_s26 = scalar_lea.sflag [#allocation10], %s744_s7 }
  0x55   : > { %s3646_s0 = scalar_lea.vmem [#allocation9], %s2621_s21 }
  0x56   : > { %3317 = dma.done.wait (%p3570_p11), %s763_s26, 1024  }
  0x57   : > { %3319 = vsyncadd (%p3570_p11), %s763_s26, 4294966272  ;;  %s3652_s2 = scalar_lea.vmem [#allocation11], %s2621_s21  ;;  %s783_s30 = scalar_lea.sflag [#allocation13], %s744_s7 }
  0x58   : > { %3321 = dma.done.wait (%p3570_p11), %s783_s30, 528  }
  0x59   : > { %3323 = vsyncadd (%p3570_p11), %s783_s30, 4294966768  ;;  %s3659_s18 = scalar_lea.vmem [#allocation14], %s2621_s21  ;;  %s802_s24 = scalar_lea.sflag [#allocation16], %s3637_s1 }
  0x5a   : > { %s3662_s17 = scalar_lea.vmem [#allocation15], %s2621_s21 }
  0x5b   : > { %3325 = dma.done.wait (%p3570_p11), %s802_s24, 512  }
  0x5c   : > { %3327 = vsyncadd (%p3570_p11), %s802_s24, 4294966784  ;;  %p903_p1 = scmp.lt.s32.totalorder %s3346_s27, 1  ;;  %s4243_s22 = sld [smem:[#allocation35_spill]] }
  0x5d   : > { %s4244_s28 = sld [smem:[#allocation38_spill]]  ;;  %p2627_p2 = scmp.ne.s32.totalorder %s3346_s27, 0 }
  0x5e   : > { %s3670_s4 = scalar_select %p903_p1, %s3346_s27, 1 }
  0x60   : > { %s2743_s15 = sshll.u32 %s3670_s4, 5  ;;  %s913_s26 = scalar_lea.vmem %s4182_s6, %s3670_s4 }
  0x61   : > { %s3680_s7 = scalar_lea.vmem %s4179_s3, %s2743_s15  ;;  %s916_s23 = scalar_lea.vmem %s4184_s8, %s3670_s4 }
  0x62   : > { %s919_s19 = scalar_lea.vmem %s4243_s22, %s3670_s4  ;;  %s4245_s15 = sld [smem:[#allocation40_spill]] }
  0x63   : > { %s922_s13 = scalar_lea.vmem %s4244_s28, %s3670_s4 }
  0x64   : > { %931 = sbr.rel (%p2627_p2) target bundleno = 110 (0x6e), region = 124 }
  0x68   : > { %s925_s5 = scalar_lea.vmem %s4245_s15, %s3670_s4 }
  0x69   : > { %v932_v0 = vld [vmem:[#allocation3] sm:$0xff]  ;;  %vm936_vm0 = vcmask 523264   ;;  %v933_v1 = vld [vmem:[#allocation3 + $0x8] sm:$0xff]  ;;  %v934_v2 = vld [vmem:[#allocation3 + $0x10] sm:$0xff] }
  0x6a   : > { %937 = vst.msk [vmem:[#allocation2] sm:$0xff] %vm936_vm0, %v932_v0  ;;  %v935_v3 = vld [vmem:[#allocation3 + $0x18] sm:$0xff] }
  0x6b   : > { %938 = vst.msk [vmem:[#allocation2 + $0x8] sm:$0xff] %vm936_vm0, %v933_v1 }
  0x6c   : > { %939 = vst.msk [vmem:[#allocation2 + $0x10] sm:$0xff] %vm936_vm0, %v934_v2 }
  0x6d   : > { %940 = vst.msk [vmem:[#allocation2 + $0x18] sm:$0xff] %vm936_vm0, %v935_v3 }
  0x6e PF: > { %vm947_vm1 = vcmask 523264   ;;  %v3361_v12 = vmov 64.0   ;;  %v2747_v39 = vld [vmem:[%s3680_s7 + $0x18] sm:$0xff]  ;;  %v2746_v40 = vld [vmem:[%s3680_s7 + $0x10] sm:$0xff]  ;;  %v2745_v41 = vld [vmem:[%s3680_s7 + $0x8] sm:$0xff]  ;;  %s4246_s22 = sld [smem:[#allocation30_spill]] }
  0x6f   : > { %2924 = vrcp.f32 %v3361_v12  ;;  %1105 = vmatpush.bf16.msra.mxu0 %v2747_v39  ;;  %2764 = vmatpush.bf16.msra.mxu1 %v2747_v39  ;;  %v2744_v46 = vld [vmem:[%s3680_s7] sm:$0xff]  ;;  %v2750_v54 = vld [vmem:[%s3646_s0 + $0x10] sm:$0xff]  ;;  %v2749_v61 = vld [vmem:[%s3646_s0 + $0x8] sm:$0xff]  ;;  %s4248_s12 = scalar_lea.vmem [#allocation6], %s3637_s1  ;;  %s4249_s28 = scalar_lea.vmem [#allocation8], %s3637_s1  ;;  %vm1253_vm15 = vcmask 130048  }
  0x70   : > { %v2751_v49 = vld [vmem:[%s3646_s0 + $0x18] sm:$0xff]  ;;  %v2748_v2 = vld [vmem:[%s3646_s0] sm:$0xff]  ;;  %s3362_s7 = smov 96   ;;  %s3363_s20 = smov 112   ;;  %vm1900_vm0 = vcmask 261120  }
  0x71   : > { %v3705_v5 = vld [vmem:[#allocation2] sm:$0xff]  ;;  %s3365_s24 = smov 64   ;;  %s3366_s16 = smov 16  }
  0x72   : > { %v948_v7 = vsel %vm947_vm1, %v3705_v5, 0.0  ;;  %v3713_v9 = vld [vmem:[#allocation2 + $0x8] sm:$0xff]  ;;  %s3367_s10 = smov 48   ;;  %s3368_s14 = smov 32  }
  0x73   : > { %v3703_v4 = vld [vmem:[#allocation2 + $0x10] sm:$0xff]  ;;  %949 = vadd.xlane.f32.xlu1 %v948_v7  ;;  %v951_v11 = vsel %vm947_vm1, %v3713_v9, 0.0  ;;  %1106 = vmatpush.bf16.msra.mxu0 %v2746_v40  ;;  %s4251_s25 = scalar_lea.vmem [#allocation12], %s3637_s1  ;;  %p2734_p3 = scmp.ne.s32.totalorder %s3346_s27, 1 }
  0x74   : > { %v954_v6 = vsel %vm947_vm1, %v3703_v4, 0.0  ;;  %v3711_v8 = vld [vmem:[#allocation2 + $0x18] sm:$0xff]  ;;  %2765 = vmatpush.bf16.msra.mxu1 %v2746_v40  ;;  %s4247_s0 = scalar_lea.vmem %s4246_s22, %s3670_s4 }
  0x75   : > { %955 = vadd.xlane.f32.xlu0 %v954_v6  ;;  %v957_v10 = vsel %vm947_vm1, %v3711_v8, 0.0  ;;  %v2925_v13 = vpop.eup %2924 }
  0x76   : > { %v961_v14 = vmul.f32 64.0, %v2925_v13  ;;  %vm965_vm2 = vweird.f32 %v2925_v13 }
  0x77   : > { %1107 = vmatpush.bf16.msra.mxu0 %v2745_v41 }
  0x78   : > { %v962_v15 = vsub.f32 1.0, %v961_v14  ;;  %2766 = vmatpush.bf16.msra.mxu1 %v2745_v41 }
  0x7a   : > { %v963_v16 = vmul.f32 %v2925_v13, %v962_v15 }
  0x7b   : > { %952 = vadd.xlane.f32.xlu1 %v951_v11  ;;  %1108 = vmatpush.bf16.msra.mxu0 %v2744_v46 }
  0x7c   : > { %v964_v17 = vadd.f32 %v2925_v13, %v963_v16  ;;  %2767 = vmatpush.bf16.msra.mxu1 %v2744_v46  ;;  %v2917_v46 = vld [vmem:[%s4249_s28] ss:$0 sm:$0xff] }
  0x7d   : > { %958 = vadd.xlane.f32.xlu0 %v957_v10 }
  0x7e   : > { %v3719_v18 = vsel %vm965_vm2, %v2925_v13, %v964_v17  ;;  %vm1905_vm2 = vcmask 392192  }
  0x80   : > { %1168 = vmatpush.bf16.msrb.mxu1 %v2751_v49 }
  0x84   : > { %1169 = vmatpush.bf16.msrb.mxu1 %v2750_v54 }
  0x88   : > { %1170 = vmatpush.bf16.msrb.mxu1 %v2749_v61 }
  0x8c   : > { %1171 = vmatpush.bf16.msrb.mxu1 %v2748_v2 }
  0xe6   : > { %v950_v20 = vpop.xlane.xlu1 %949 }
  0xe7   : > { %v967_v22 = vmul.f32 %v3719_v18, %v950_v20 }
  0xe8   : > { %v956_v19 = vpop.xlane.xlu0 %955 }
  0xe9   : > { %v969_v21 = vmul.f32 %v3719_v18, %v956_v19  ;;  %v3727_v24 = vsub.f32 %v3705_v5, %v967_v22 }
  0xeb   : > { %v3724_v23 = vsub.f32 %v3703_v4, %v969_v21  ;;  %v975_v26 = vmul.f32 %v3727_v24, %v3727_v24 }
  0xed   : > { %v977_v25 = vmul.f32 %v3724_v23, %v3724_v23  ;;  %v979_v28 = vsel %vm947_vm1, %v975_v26, 0.0 }
  0xee   : > { %980 = vadd.xlane.f32.xlu0 %v979_v28  ;;  %v953_v30 = vpop.xlane.xlu1 %952 }
  0xef   : > { %v985_v27 = vsel %vm947_vm1, %v977_v25, 0.0  ;;  %v968_v32 = vmul.f32 %v3719_v18, %v953_v30 }
  0xf0   : > { %986 = vadd.xlane.f32.xlu2 %v985_v27  ;;  %v959_v29 = vpop.xlane.xlu0 %958  ;;  %v2915_v27 = vld [vmem:[%s4247_s0] ss:$0 sm:$0xff] }
  0xf1   : > { %v970_v31 = vmul.f32 %v3719_v18, %v959_v29  ;;  %v3741_v34 = vsub.f32 %v3713_v9, %v968_v32 }
  0xf3   : > { %v3738_v33 = vsub.f32 %v3711_v8, %v970_v31  ;;  %v976_v36 = vmul.f32 %v3741_v34, %v3741_v34 }
  0xf5   : > { %v978_v35 = vmul.f32 %v3738_v33, %v3738_v33  ;;  %v982_v38 = vsel %vm947_vm1, %v976_v36, 0.0  ;;  %v2916_v36 = vld [vmem:[%s4248_s12] ss:$0 sm:$0xff] }
  0xf6   : > { %983 = vadd.xlane.f32.xlu1 %v982_v38 }
  0xf7   : > { %v988_v37 = vsel %vm947_vm1, %v978_v35, 0.0 }
  0xf8   : > { %989 = vadd.xlane.f32.xlu2 %v988_v37 }
 0x161   : > { %v981_v43 = vpop.xlane.xlu0 %980 }
 0x162   : > { %v991_v45 = vmul.f32 %v981_v43, %v3719_v18 }
 0x163   : > { %v987_v42 = vpop.xlane.xlu2 %986 }
 0x164   : > { %v993_v44 = vmul.f32 %v987_v42, %v3719_v18  ;;  %v995_v48 = vadd.f32 1e-08, %v991_v45  ;;  %v1121_v45 = vpack.c.bf16 %v3711_v8, %v3703_v4 }
 0x166   : > { %v997_v47 = vadd.f32 1e-08, %v993_v44  ;;  %vm1005_vm3 = vweird.f32 %v995_v48 }
 0x168   : > { %2926 = vrsqrt.f32 %v997_v47  ;;  %vm1025_vm6 = vweird.f32 %v997_v47 }
 0x169   : > { %2928 = vrsqrt.f32 %v995_v48  ;;  %v984_v51 = vpop.xlane.xlu1 %983 }
 0x16a   : > { %v992_v53 = vmul.f32 %v984_v51, %v3719_v18 }
 0x16b   : > { %v990_v50 = vpop.xlane.xlu2 %989 }
 0x16c   : > { %v994_v52 = vmul.f32 %v990_v50, %v3719_v18  ;;  %v996_v57 = vadd.f32 1e-08, %v992_v53  ;;  %v2918_v53 = vld [vmem:[%s913_s26] ss:$0 sm:$0xff]  ;;  %s3364_s26 = smov 80  }
 0x16e   : > { %v2927_v55 = vpop.eup %2926  ;;  %v998_v56 = vadd.f32 1e-08, %v994_v52  ;;  %vm1015_vm9 = vweird.f32 %v996_v57 }
 0x16f   : > { %v2929_v58 = vpop.eup %2928  ;;  %v1020_v59 = vmul.f32 %v2927_v55, %v997_v47  ;;  %vm1026_vm5 = vweird.f32 %v2927_v55 }
 0x170   : > { %v1000_v60 = vmul.f32 %v2929_v58, %v995_v48  ;;  %2930 = vrsqrt.f32 %v998_v56  ;;  %vm1006_vm4 = vweird.f32 %v2929_v58  ;;  %vm1027_vm8 = vmor %vm1025_vm6, %vm1026_vm5  ;;  %vm1035_vm12 = vweird.f32 %v998_v56 }
 0x171   : > { %v1021_v62 = vmul.f32 %v2927_v55, %v1020_v59  ;;  %2932 = vrsqrt.f32 %v996_v57  ;;  %vm1007_vm7 = vmor %vm1005_vm3, %vm1006_vm4 }
 0x172   : > { %v1001_v63 = vmul.f32 %v2929_v58, %v1000_v60 }
 0x173   : > { %v1022_v0 = vmul.f32 0.5, %v1021_v62 }
 0x174   : > { %v1002_v1 = vmul.f32 0.5, %v1001_v63 }
 0x175   : > { %v1023_v3 = vsub.f32 1.5, %v1022_v0 }
 0x176   : > { %v2931_v6 = vpop.eup %2930  ;;  %v1003_v7 = vsub.f32 1.5, %v1002_v1 }
 0x177   : > { %v2933_v10 = vpop.eup %2932  ;;  %v1024_v11 = vmul.f32 %v2927_v55, %v1023_v3  ;;  %v1030_v12 = vmul.f32 %v2931_v6, %v998_v56  ;;  %vm1036_vm11 = vweird.f32 %v2931_v6 }
 0x178   : > { %v1004_v13 = vmul.f32 %v2929_v58, %v1003_v7  ;;  %v1010_v14 = vmul.f32 %v2933_v10, %v996_v57  ;;  %vm1016_vm10 = vweird.f32 %v2933_v10  ;;  %vm1037_vm14 = vmor %vm1035_vm12, %vm1036_vm11 }
 0x179   : > { %v1031_v15 = vmul.f32 %v2931_v6, %v1030_v12  ;;  %v1028_v17 = vsel %vm1027_vm8, %v2927_v55, %v1024_v11  ;;  %vm1017_vm13 = vmor %vm1015_vm9, %vm1016_vm10 }
 0x17a   : > { %v1011_v16 = vmul.f32 %v2933_v10, %v1010_v14  ;;  %v1008_v20 = vsel %vm1007_vm7, %v2929_v58, %v1004_v13  ;;  %v1041_v25 = vmul.f32 %v1028_v17, %v3724_v23 }
 0x17b   : > { %v1032_v19 = vmul.f32 0.5, %v1031_v15  ;;  %v1039_v28 = vmul.f32 %v1008_v20, %v3727_v24 }
 0x17c   : > { %v1012_v21 = vmul.f32 0.5, %v1011_v16  ;;  %v1048_v23 = vmul.f32 %v2915_v27, %v1041_v25 }
 0x17d   : > { %v1033_v22 = vsub.f32 1.5, %v1032_v19  ;;  %v1046_v38 = vmul.f32 %v2915_v27, %v1039_v28 }
 0x17e   : > { %v1013_v26 = vsub.f32 1.5, %v1012_v21  ;;  %v3772_v41 = vadd.f32 %v2916_v36, %v1048_v23 }
 0x17f   : > { %v1034_v29 = vmul.f32 %v2931_v6, %v1033_v22  ;;  %v3776_v42 = vadd.f32 %v2916_v36, %v1046_v38 }
 0x180   : > { %v1014_v30 = vmul.f32 %v2933_v10, %v1013_v26 }
 0x181   : > { %v1038_v31 = vsel %vm1037_vm14, %v2931_v6, %v1034_v29 }
 0x182   : > { %v1042_v32 = vmul.f32 %v1038_v31, %v3738_v33  ;;  %v1018_v35 = vsel %vm1017_vm13, %v2933_v10, %v1014_v30 }
 0x183   : > { %v1040_v37 = vmul.f32 %v1018_v35, %v3741_v34  ;;  %v1120_v34 = vpack.c.bf16 %v3713_v9, %v3705_v5 }
 0x184   : > { %v1049_v39 = vmul.f32 %v2915_v27, %v1042_v32 }
 0x185   : > { %v1047_v40 = vmul.f32 %v2915_v27, %v1040_v37 }
 0x186   : > { %v3774_v24 = vadd.f32 %v2916_v36, %v1049_v39 }
 0x187   : > { %v3778_v43 = vadd.f32 %v2916_v36, %v1047_v40 }
 0x188   : > { %v1058_v33 = vpack.c.bf16 %v3774_v24, %v3772_v41 }
 0x189   : > { %v1057_v44 = vpack.c.bf16 %v3778_v43, %v3776_v42 }
 0x18a   : > { %2645 = vmatmul.msk.bf16.vlgmr.msra.gmra.mxu1 %vm947_vm1, %v1058_v33 }
 0x18b   : > { %2644 = vmatmul.msk.bf16.vlgmr.msra.gmra.mxu0 %vm947_vm1, %v1057_v44 }
 0x19a   : > { %2662 = vmatmul.msk.bf16.vlgmr.msrb.gmra.mxu1 %vm947_vm1, %v1120_v34 }
 0x1aa   : > { %2663 = vmatmul.msk.bf16.gmra.mxu1 %vm947_vm1, %v1121_v45 }
 0x207   : > { %v1115_v47 = vpop.f32.mrf.mxu1 }
 0x208   : > { %v1110_v48 = vpop.f32.mrf.mxu0  ;;  %v1116_v57 = vadd.f32 %v2917_v46, %v1115_v47 }
 0x209   : > { %v1111_v49 = vadd.f32 %v2917_v46, %v1110_v48 }
 0x20a   : > { %v1185_v61 = vpack.c.bf16 %v1116_v57, %v1116_v57 }
 0x20b   : > { %v1183_v50 = vpack.c.bf16 %v1111_v49, %v1111_v49 }
 0x20c   : > { %v1274_v21 = vunpack.c.l.b16 %v1185_v61 }
 0x20d   : > { %1203 = vrot.lane.b32.xlu0 %v1183_v50, %s3362_s7  ;;  %1195 = vrot.lane.b32.xlu1 %v1183_v50, %s3363_s20  ;;  %v1247_v7 = vunpack.c.l.b16 %v1183_v50 }
 0x20f   : > { %v1117_v5 = vpop.f32.mrf.mxu1 }
 0x210   : > { %v1112_v9 = vpop.f32.mrf.mxu0  ;;  %v1118_v51 = vadd.f32 %v2917_v46, %v1117_v5 }
 0x211   : > { %v1113_v52 = vadd.f32 %v2917_v46, %v1112_v9 }
 0x212   : > { %v1186_v4 = vpack.c.bf16 %v1118_v51, %v1118_v51 }
 0x213   : > { %v1184_v8 = vpack.c.bf16 %v1113_v52, %v1113_v52 }
 0x214   : > { %v1275_v20 = vunpack.c.l.b16 %v1186_v4 }
 0x215   : > { %1197 = vrot.lane.b32.xlu2 %v1184_v8, %s3363_s20  ;;  %1201 = vrot.lane.b32.xlu1 %v1186_v4, %s3363_s20  ;;  %v1248_v6 = vunpack.c.l.b16 %v1184_v8 }
 0x216   : > { %v1276_v22 = vpack.c.b16 %v1275_v20, %v1274_v21 }
 0x217   : > { %v1173_v54 = vpop.f32.mrf.mxu1  ;;  %v1249_v11 = vpack.c.b16 %v1248_v6, %v1247_v7 }
 0x218   : > { %v1174_v55 = vadd.f32 %v2918_v53, %v1173_v54 }
 0x21a   : > { %v1187_v56 = vpack.c.bf16 %v1174_v55, %v1174_v55 }
 0x21c   : > { %v1250_v62 = vunpack.c.l.b16 %v1187_v56 }
 0x21d   : > { %1223 = vrot.lane.b32.xlu2 %v1187_v56, %s3363_s20  ;;  %1231 = vrot.lane.b32.xlu1 %v1187_v56, %s3362_s7 }
 0x21f   : > { %v1175_v58 = vpop.f32.mrf.mxu1 }
 0x220   : > { %v1176_v59 = vadd.f32 %v2918_v53, %v1175_v58 }
 0x222   : > { %v1188_v60 = vpack.c.bf16 %v1176_v59, %v1176_v59 }
 0x224   : > { %1225 = vrot.lane.b32.xlu0 %v1188_v60, %s3363_s20  ;;  %v1251_v63 = vunpack.c.l.b16 %v1188_v60 }
 0x225   : > { %1199 = vrot.lane.b32.xlu2 %v1185_v61, %s3363_s20  ;;  %1239 = vrot.lane.b32.xlu1 %v1187_v56, %s3364_s26 }
 0x226   : > { %v1252_v0 = vpack.c.b16 %v1251_v63, %v1250_v62 }
 0x227   : > { %v1178_v1 = vpop.f32.mrf.mxu1 }
 0x228   : > { %v1258_v2 = vsel %vm1253_vm15, %v1252_v0, 0  ;;  %v1179_v3 = vadd.f32 %v2918_v53, %v1178_v1 }
 0x229   : > { %1267 = vmatpush.bf16.xpose.msra.mxu2 %v1258_v2 }
 0x22a   : > { %v1189_v10 = vpack.c.bf16 %v1179_v3, %v1179_v3 }
 0x22c   : > { %1233 = vrot.lane.b32.xlu0 %v1188_v60, %s3362_s7  ;;  %v1277_v15 = vunpack.c.l.b16 %v1189_v10 }
 0x22f   : > { %v1180_v12 = vpop.f32.mrf.mxu1 }
 0x230   : > { %v1181_v13 = vadd.f32 %v2918_v53, %v1180_v12  ;;  %2664 = vmatmul.msk.bf16.vlgmr.msra.gmra.mxu2 %vm1253_vm15, %v1249_v11 }
 0x232   : > { %v1190_v14 = vpack.c.bf16 %v1181_v13, %v1181_v13 }
 0x234   : > { %1229 = vrot.lane.b32.xlu2 %v1190_v14, %s3363_s20  ;;  %1227 = vrot.lane.b32.xlu0 %v1189_v10, %s3363_s20  ;;  %v1278_v16 = vunpack.c.l.b16 %v1190_v14 }
 0x235   : > { %1237 = vrot.lane.b32.xlu1 %v1190_v14, %s3362_s7 }
 0x236   : > { %v1279_v17 = vpack.c.b16 %v1278_v16, %v1277_v15 }
 0x238   : > { %v1284_v19 = vsel %vm1253_vm15, %v1279_v17, 0 }
 0x239   : > { %1293 = vmatpush.bf16.xpose.msra.mxu3 %v1284_v19 }
 0x23c   : > { %1205 = vrot.lane.b32.xlu2 %v1184_v8, %s3362_s7  ;;  %1241 = vrot.lane.b32.xlu0 %v1188_v60, %s3364_s26 }
 0x23d   : > { %1207 = vrot.lane.b32.xlu1 %v1185_v61, %s3362_s7 }
 0x240   : > { %2665 = vmatmul.msk.bf16.vlgmr.msra.gmra.mxu3 %vm1253_vm15, %v1276_v22 }
 0x244   : > { %1235 = vrot.lane.b32.xlu2 %v1189_v10, %s3362_s7  ;;  %1211 = vrot.lane.b32.xlu0 %v1183_v50, %s3364_s26 }
 0x245   : > { %1245 = vrot.lane.b32.xlu1 %v1190_v14, %s3364_s26 }
 0x24c   : > { %1213 = vrot.lane.b32.xlu2 %v1184_v8, %s3364_s26  ;;  %1209 = vrot.lane.b32.xlu0 %v1186_v4, %s3362_s7  ;;  %s4255_s7 = sld [smem:[#allocation42_spill]] (!%p2734_p3) }
 0x24d   : > { %1678 = vrot.lane.b32.xlu1 %v1279_v17, %s3365_s24 }
 0x254   : > { %1243 = vrot.lane.b32.xlu2 %v1189_v10, %s3364_s26  ;;  %1215 = vrot.lane.b32.xlu0 %v1185_v61, %s3364_s26 }
 0x25c   : > { %1217 = vrot.lane.b32.xlu2 %v1186_v4, %s3364_s26 }
 0x264   : > { %1653 = vrot.lane.b32.xlu2 %v1252_v0, %s3365_s24 }
 0x26f   : > { %v1198_v25 = vpop.permute.xlu2 %1197 }
 0x270   : > { %v1301_v34 = vunpack.c.l.b16 %v1198_v25 }
 0x277   : > { %v1224_v26 = vpop.permute.xlu2 %1223 }
 0x278   : > { %v1303_v23 = vunpack.c.l.b16 %v1224_v26 }
 0x27f   : > { %v1196_v27 = vpop.permute.xlu1 %1195  ;;  %v1200_v28 = vpop.permute.xlu2 %1199 }
 0x280   : > { %v1204_v30 = vpop.permute.xlu0 %1203  ;;  %v1300_v40 = vunpack.c.l.b16 %v1196_v27  ;;  %v1326_v62 = vunpack.c.l.b16 %v1200_v28 }
 0x281   : > { %v1352_v63 = vunpack.c.l.b16 %v1204_v30 }
 0x282   : > { %v1302_v48 = vpack.c.b16 %v1301_v34, %v1300_v40 }
 0x287   : > { %v1202_v29 = vpop.permute.xlu1 %1201 }
 0x288   : > { %v1327_v58 = vunpack.c.l.b16 %v1202_v29 }
 0x28a   : > { %v1328_v3 = vpack.c.b16 %v1327_v58, %v1326_v62 }
 0x28e   : > { %v1230_v31 = vpop.permute.xlu2 %1229 }
 0x28f   : > { %v1232_v32 = vpop.permute.xlu1 %1231  ;;  %v1330_v51 = vunpack.c.l.b16 %v1230_v31 }
 0x290   : > { %v1355_v45 = vunpack.c.l.b16 %v1232_v32 }
 0x296   : > { %v1206_v35 = vpop.permute.xlu2 %1205  ;;  %v1226_v36 = vpop.permute.xlu0 %1225 }
 0x297   : > { %v1304_v37 = vunpack.c.l.b16 %v1226_v36  ;;  %v1240_v46 = vpop.permute.xlu1 %1239  ;;  %v1353_v59 = vunpack.c.l.b16 %v1206_v35 }
 0x298   : > { %v1407_v0 = vunpack.c.l.b16 %v1240_v46 }
 0x299   : > { %v1305_v38 = vpack.c.b16 %v1304_v37, %v1303_v23  ;;  %v1354_v6 = vpack.c.b16 %v1353_v59, %v1352_v63 }
 0x29b   : > { %1703 = vrot.lane.b32.xlu1 %v1305_v38, %s3365_s24  ;;  %v1310_v39 = vsel %vm1253_vm15, %v1305_v38, 0 }
 0x29c   : > { %1319 = vmatpush.bf16.xpose.msrb.mxu2 %v1310_v39 }
 0x29e   : > { %v1236_v33 = vpop.permute.xlu2 %1235  ;;  %v1234_v44 = vpop.permute.xlu0 %1233 }
 0x29f   : > { %v1356_v47 = vunpack.c.l.b16 %v1234_v44  ;;  %v1381_v8 = vunpack.c.l.b16 %v1236_v33 }
 0x2a1   : > { %v1357_v49 = vpack.c.b16 %v1356_v47, %v1355_v45 }
 0x2a3   : > { %1753 = vrot.lane.b32.xlu0 %v1357_v49, %s3365_s24  ;;  %2666 = vmatmul.msk.bf16.vlgmr.msrb.gmra.mxu2 %vm1253_vm15, %v1302_v48  ;;  %v1362_v50 = vsel %vm1253_vm15, %v1357_v49, 0 }
 0x2a4   : > { %1371 = vmatpush.bf16.xpose.msra.mxu2 %v1362_v50 }
 0x2a6   : > { %v1214_v5 = vpop.permute.xlu2 %1213  ;;  %v1228_v9 = vpop.permute.xlu0 %1227 }
 0x2a7   : > { %v1329_v52 = vunpack.c.l.b16 %v1228_v9  ;;  %v1238_v4 = vpop.permute.xlu1 %1237  ;;  %v1405_v13 = vunpack.c.l.b16 %v1214_v5 }
 0x2a8   : > { %v1382_v53 = vunpack.c.l.b16 %v1238_v4 }
 0x2a9   : > { %v1331_v54 = vpack.c.b16 %v1330_v51, %v1329_v52 }
 0x2aa   : > { %v3834_v55 = vpack.c.b16 %v1382_v53, %v1381_v8 }
 0x2ab   : > { %1728 = vrot.lane.b32.xlu2 %v1331_v54, %s3365_s24  ;;  %v1336_v56 = vsel %vm1253_vm15, %v1331_v54, 0 }
 0x2ac   : > { %1345 = vmatpush.bf16.xpose.msrb.mxu3 %v1336_v56  ;;  %v1388_v57 = vsel %vm1253_vm15, %v3834_v55, 0 }
 0x2ae   : > { %v1244_v60 = vpop.permute.xlu2 %1243  ;;  %v1242_v61 = vpop.permute.xlu0 %1241 }
 0x2af   : > { %v1408_v1 = vunpack.c.l.b16 %v1242_v61  ;;  %v1208_v2 = vpop.permute.xlu1 %1207  ;;  %v1433_v16 = vunpack.c.l.b16 %v1244_v60 }
 0x2b0   : > { %v1378_v26 = vunpack.c.l.b16 %v1208_v2 }
 0x2b1   : > { %v3840_v7 = vpack.c.b16 %v1408_v1, %v1407_v0 }
 0x2b3   : > { %2667 = vmatmul.msk.bf16.vlgmr.msrb.gmra.mxu3 %vm1253_vm15, %v1328_v3  ;;  %2668 = vmatmul.msk.bf16.vlgmr.msra.gmra.mxu2 %vm1253_vm15, %v1354_v6  ;;  %v1414_v10 = vsel %vm1253_vm15, %v3840_v7, 0  ;;  %v1269_v27 = vpop.f32.mrf.mxu2 }
 0x2b4   : > { %1397 = vmatpush.bf16.xpose.msra.mxu3 %v1388_v57  ;;  %1423 = vmatpush.bf16.xpose.msrb.mxu0 %v1414_v10  ;;  %v1456_v31 = vsel %vm1253_vm15, %v1269_v27, -inf }
 0x2b6   : > { %v1218_v11 = vpop.permute.xlu2 %1217  ;;  %v1212_v12 = vpop.permute.xlu0 %1211 }
 0x2b7   : > { %v1404_v14 = vunpack.c.l.b16 %v1212_v12  ;;  %v1246_v15 = vpop.permute.xlu1 %1245  ;;  %v1431_v36 = vunpack.c.l.b16 %v1218_v11 }
 0x2b8   : > { %v1434_v17 = vunpack.c.l.b16 %v1246_v15 }
 0x2b9   : > { %v1406_v19 = vpack.c.b16 %v1405_v13, %v1404_v14 }
 0x2ba   : > { %v3846_v20 = vpack.c.b16 %v1434_v17, %v1433_v16 }
 0x2bb   : > { %2670 = vmatmul.msk.bf16.vlgmr.msrb.gmra.mxu0 %vm1253_vm15, %v1406_v19  ;;  %v1271_v37 = vpop.f32.mrf.mxu2 }
 0x2bc   : > { %v1440_v21 = vsel %vm1253_vm15, %v3846_v20, 0  ;;  %v1459_v39 = vsel %vm1253_vm15, %v1271_v37, -inf }
 0x2bd   : > { %1449 = vmatpush.bf16.xpose.msra.mxu1 %v1440_v21 }
 0x2be   : > { %v1654_v22 = vpop.permute.xlu2 %1653  ;;  %v1210_v25 = vpop.permute.xlu0 %1209 }
 0x2bf   : > { %v1379_v28 = vunpack.c.l.b16 %v1210_v25  ;;  %v1679_v29 = vpop.permute.xlu1 %1678  ;;  %1666 = vmatpush.bf16.msrb.mxu2 %v1654_v22 }
 0x2c0   : > { %1691 = vmatpush.bf16.msrb.mxu3 %v1679_v29 }
 0x2c1   : > { %v1380_v30 = vpack.c.b16 %v1379_v28, %v1378_v26 }
 0x2c3   : > { %2669 = vmatmul.msk.bf16.vlgmr.msra.gmra.mxu3 %vm1253_vm15, %v1380_v30  ;;  %v3853_v32 = vpop.f32.mrf.mxu3 }
 0x2c4   : > { %v1462_v44 = vsel %vm1253_vm15, %v3853_v32, -inf }
 0x2c5   : > { %1457 = vmax.xlane.f32.xlu1 %v1456_v31 }
 0x2c6   : > { %v1216_v35 = vpop.permute.xlu0 %1215 }
 0x2c7   : > { %v1430_v23 = vunpack.c.l.b16 %v1216_v35 }
 0x2c9   : > { %v1432_v38 = vpack.c.b16 %v1431_v36, %v1430_v23 }
 0x2cb   : > { %2671 = vmatmul.msk.bf16.vlgmr.msra.gmra.mxu1 %vm1253_vm15, %v1432_v38  ;;  %v1297_v40 = vpop.f32.mrf.mxu3 }
 0x2cc   : > { %v1465_v33 = vsel %vm1253_vm15, %v1297_v40, -inf }
 0x2cd   : > { %1460 = vmax.xlane.f32.xlu0 %v1459_v39 }
 0x2d4   : > { %1466 = vmax.xlane.f32.xlu2 %v1465_v33 }
 0x2d5   : > { %1463 = vmax.xlane.f32.xlu0 %v1462_v44 }
 0x305   : > { %v1729_v34 = vpop.permute.xlu2 %1728 }
 0x306   : > { %1741 = vmatpush.bf16.msrb.mxu1 %v1729_v34 }
 0x30d   : > { %v1704_v45 = vpop.permute.xlu1 %1703 }
 0x30e   : > { %1716 = vmatpush.bf16.msra.mxu0 %v1704_v45 }
 0x315   : > { %v1754_v46 = vpop.permute.xlu0 %1753 }
 0x316   : > { %1766 = vmatpush.bf16.msra.mxu2 %v1754_v46 }
 0x326   : > { %v3860_v47 = vpop.f32.mrf.mxu2 }
 0x327   : > { %v1468_v48 = vsel %vm1253_vm15, %v3860_v47, -inf }
 0x328   : > { %1469 = vmax.xlane.f32.xlu2 %v1468_v48 }
 0x32e   : > { %v3864_v49 = vpop.f32.mrf.mxu2 }
 0x32f   : > { %v1471_v50 = vsel %vm1253_vm15, %v3864_v49, -inf }
 0x330   : > { %1472 = vmax.xlane.f32.xlu1 %v1471_v50 }
 0x336   : > { %v3868_v5 = vpop.f32.mrf.mxu2  ;;  %v3876_v53 = vpop.f32.mrf.mxu3 }
 0x337   : > { %v1480_v9 = vsel %vm1253_vm15, %v3868_v5, -inf  ;;  %v1474_v16 = vsel %vm1253_vm15, %v3876_v53, -inf }
 0x338   : > { %v3872_v51 = vpop.f32.mrf.mxu0  ;;  %v1458_v52 = vpop.xlane.xlu1 %1457  ;;  %1481 = vmax.xlane.f32.xlu1 %v1480_v9 }
 0x339   : > { %v1504_v4 = vsub.f32 %v1269_v27, %v1458_v52  ;;  %v1492_v8 = vsel %vm1253_vm15, %v3872_v51, -inf }
 0x33a   : > { %1493 = vmax.xlane.f32.xlu0 %v1492_v8 }
 0x33b   : > { %v1520_v54 = vmul.f32 1.442695, %v1504_v4 }
 0x33d   : > { %2934 = vpow2.f32 %v1520_v54 }
 0x33e   : > { %v3886_v61 = vpop.f32.mrf.mxu3  ;;  %v3890_v2 = vpop.f32.mrf.mxu2 }
 0x33f   : > { %v1483_v11 = vsel %vm1253_vm15, %v3890_v2, -inf  ;;  %v1477_v28 = vsel %vm1253_vm15, %v3886_v61, -inf }
 0x340   : > { %v3878_v56 = vpop.f32.mrf.mxu0  ;;  %v1461_v59 = vpop.xlane.xlu0 %1460 }
 0x341   : > { %v1495_v57 = vsel %vm1253_vm15, %v3878_v56, -inf  ;;  %v1505_v63 = vsub.f32 %v1271_v37, %v1461_v59 }
 0x342   : > { %1496 = vmax.xlane.f32.xlu2 %v1495_v57 }
 0x343   : > { %v3882_v58 = vpop.eup %2934  ;;  %v1522_v10 = vmul.f32 1.442695, %v1505_v63 }
 0x344   : > { %v1552_v60 = vsel %vm1253_vm15, %v3882_v58, 0.0 }
 0x345   : > { %1553 = vadd.xlane.f32.xlu0 %v1552_v60 }
 0x346   : > { %v3896_v13 = vpop.f32.mrf.mxu3 }
 0x347   : > { %v1467_v62 = vpop.xlane.xlu2 %1466 }
 0x348   : > { %v1507_v0 = vsub.f32 %v1297_v40, %v1467_v62  ;;  %v3888_v1 = vpop.f32.mrf.mxu1  ;;  %v1464_v12 = vpop.xlane.xlu0 %1463 }
 0x349   : > { %v1498_v3 = vsel %vm1253_vm15, %v3888_v1, -inf  ;;  %v1506_v14 = vsub.f32 %v3853_v32, %v1464_v12  ;;  %v1486_v32 = vsel %vm1253_vm15, %v3896_v13, -inf }
 0x34a   : > { %v1526_v6 = vmul.f32 1.442695, %v1507_v0  ;;  %1499 = vmax.xlane.f32.xlu2 %v1498_v3 }
 0x34b   : > { %v1524_v22 = vmul.f32 1.442695, %v1506_v14 }
 0x34c   : > { %2936 = vpow2.f32 %v1526_v6 }
 0x34d   : > { %1484 = vmax.xlane.f32.xlu0 %v1483_v11  ;;  %2938 = vpow2.f32 %v1522_v10 }
 0x34e   : > { %2940 = vpow2.f32 %v1524_v22  ;;  %v3911_v26 = vpop.f32.mrf.mxu3 }
 0x34f   : > { %v1489_v29 = vsel %vm1253_vm15, %v3911_v26, -inf }
 0x350   : > { %v3899_v15 = vpop.f32.mrf.mxu1 }
 0x351   : > { %v1501_v17 = vsel %vm1253_vm15, %v3899_v15, -inf }
 0x352   : > { %v3905_v19 = vpop.eup %2936  ;;  %1475 = vmax.xlane.f32.xlu2 %v1474_v16  ;;  %1502 = vmax.xlane.f32.xlu1 %v1501_v17 }
 0x353   : > { %v1561_v21 = vsel %vm1253_vm15, %v3905_v19, 0.0  ;;  %v3909_v25 = vpop.eup %2938 }
 0x354   : > { %v1555_v27 = vsel %vm1253_vm15, %v3909_v25, 0.0  ;;  %v3919_v30 = vpop.eup %2940 }
 0x355   : > { %1562 = vadd.xlane.f32.xlu0 %v1561_v21  ;;  %v1558_v31 = vsel %vm1253_vm15, %v3919_v30, 0.0 }
 0x35a   : > { %1556 = vadd.xlane.f32.xlu2 %v1555_v27  ;;  %1478 = vmax.xlane.f32.xlu1 %v1477_v28 }
 0x35d   : > { %1490 = vmax.xlane.f32.xlu0 %v1489_v29 }
 0x362   : > { %1559 = vadd.xlane.f32.xlu1 %v1558_v31 }
 0x36a   : > { %1487 = vmax.xlane.f32.xlu1 %v1486_v32 }
 0x39b   : > { %v1470_v35 = vpop.xlane.xlu2 %1469 }
 0x39c   : > { %v1508_v36 = vsub.f32 %v3860_v47, %v1470_v35 }
 0x39e   : > { %v1528_v23 = vmul.f32 1.442695, %v1508_v36 }
 0x3a0   : > { %2942 = vpow2.f32 %v1528_v23 }
 0x3a3   : > { %v1473_v37 = vpop.xlane.xlu1 %1472 }
 0x3a4   : > { %v1509_v4 = vsub.f32 %v3864_v49, %v1473_v37 }
 0x3a6   : > { %v3926_v38 = vpop.eup %2942  ;;  %v1530_v54 = vmul.f32 1.442695, %v1509_v4 }
 0x3a7   : > { %v1564_v39 = vsel %vm1253_vm15, %v3926_v38, 0.0 }
 0x3a8   : > { %1565 = vadd.xlane.f32.xlu1 %v1564_v39 }
 0x3ab   : > { %v1482_v40 = vpop.xlane.xlu1 %1481 }
 0x3ac   : > { %v1512_v33 = vsub.f32 %v3868_v5, %v1482_v40 }
 0x3ad   : > { %v1494_v44 = vpop.xlane.xlu0 %1493 }
 0x3ae   : > { %v1536_v34 = vmul.f32 1.442695, %v1512_v33  ;;  %v1516_v45 = vsub.f32 %v3872_v51, %v1494_v44 }
 0x3b0   : > { %2944 = vpow2.f32 %v1536_v34  ;;  %v1544_v46 = vmul.f32 1.442695, %v1516_v45 }
 0x3b2   : > { %2946 = vpow2.f32 %v1544_v46 }
 0x3b5   : > { %v1497_v47 = vpop.xlane.xlu2 %1496 }
 0x3b6   : > { %v3932_v48 = vpop.eup %2944  ;;  %v1517_v50 = vsub.f32 %v3878_v56, %v1497_v47 }
 0x3b7   : > { %v1576_v9 = vsel %vm1253_vm15, %v3932_v48, 0.0 }
 0x3b8   : > { %v3937_v52 = vpop.eup %2946  ;;  %v1546_v5 = vmul.f32 1.442695, %v1517_v50  ;;  %v1554_v8 = vpop.xlane.xlu0 %1553  ;;  %1577 = vadd.xlane.f32.xlu1 %v1576_v9 }
 0x3b9   : > { %v1588_v51 = vsel %vm1253_vm15, %v3937_v52, 0.0 }
 0x3ba   : > { %2948 = vpow2.f32 %v1546_v5  ;;  %1589 = vadd.xlane.f32.xlu0 %v1588_v51 }
 0x3bb   : > { %2950 = vpow2.f32 %v1530_v54 }
 0x3bd   : > { %v1500_v57 = vpop.xlane.xlu2 %1499 }
 0x3be   : > { %v1518_v59 = vsub.f32 %v3888_v1, %v1500_v57 }
 0x3c0   : > { %v3943_v56 = vpop.eup %2948  ;;  %v1548_v60 = vmul.f32 1.442695, %v1518_v59  ;;  %v1485_v62 = vpop.xlane.xlu0 %1484 }
 0x3c1   : > { %v1591_v49 = vsel %vm1253_vm15, %v3943_v56, 0.0  ;;  %v3949_v3 = vpop.eup %2950  ;;  %v1513_v1 = vsub.f32 %v3890_v2, %v1485_v62 }
 0x3c2   : > { %2952 = vpow2.f32 %v1548_v60  ;;  %1592 = vadd.xlane.f32.xlu0 %v1591_v49  ;;  %v1567_v16 = vsel %vm1253_vm15, %v3949_v3, 0.0 }
 0x3c3   : > { %2954 = vrcp.f32 %v1554_v8  ;;  %v1538_v17 = vmul.f32 1.442695, %v1513_v1 }
 0x3c5   : > { %v1476_v63 = vpop.xlane.xlu2 %1475  ;;  %v3947_v0 = vpop.xlane.xlu1 %1502 }
 0x3c6   : > { %v1510_v6 = vsub.f32 %v3876_v53, %v1476_v63 }
 0x3c8   : > { %v3953_v10 = vpop.eup %2952  ;;  %v1532_v11 = vmul.f32 1.442695, %v1510_v6  ;;  %v1563_v12 = vpop.xlane.xlu0 %1562 }
 0x3c9   : > { %v1594_v14 = vsel %vm1253_vm15, %v3953_v10, 0.0  ;;  %v2955_v21 = vpop.eup %2954 }
 0x3ca   : > { %2956 = vpow2.f32 %v1532_v11  ;;  %1595 = vadd.xlane.f32.xlu1 %v1594_v14  ;;  %1568 = vadd.xlane.f32.xlu0 %v1567_v16  ;;  %v1616_v28 = vmul.f32 %v2955_v21, %v3882_v58 }
 0x3cc   : > { %v1632_v23 = vpack.c.bf16 %v1616_v28, %v1616_v28 }
 0x3cd   : > { %v1557_v22 = vpop.xlane.xlu2 %1556  ;;  %v1479_v53 = vpop.xlane.xlu1 %1478 }
 0x3ce   : > { %2958 = vrcp.f32 %v1557_v22  ;;  %v1511_v2 = vsub.f32 %v3886_v61, %v1479_v53  ;;  %v1650_v34 = vunpack.c.l.b16 %v1632_v23 }
 0x3cf   : > { %2960 = vpow2.f32 %v1538_v17 }
 0x3d0   : > { %v3960_v27 = vpop.eup %2956  ;;  %2962 = vrcp.f32 %v1563_v12  ;;  %v1534_v29 = vmul.f32 1.442695, %v1511_v2  ;;  %v1491_v31 = vpop.xlane.xlu0 %1490 }
 0x3d1   : > { %v1515_v32 = vsub.f32 %v3911_v26, %v1491_v31  ;;  %v1570_v35 = vsel %vm1253_vm15, %v3960_v27, 0.0 }
 0x3d2   : > { %2964 = vpow2.f32 %v1534_v29  ;;  %1571 = vadd.xlane.f32.xlu0 %v1570_v35 }
 0x3d3   : > { %v1542_v37 = vmul.f32 1.442695, %v1515_v32 }
 0x3d4   : > { %v2959_v36 = vpop.eup %2958 }
 0x3d5   : > { %v3966_v39 = vpop.eup %2960  ;;  %v1617_v61 = vmul.f32 %v2959_v36, %v3909_v25  ;;  %v1560_v40 = vpop.xlane.xlu1 %1559 }
 0x3d6   : > { %v2963_v33 = vpop.eup %2962  ;;  %2966 = vrcp.f32 %v1560_v40  ;;  %v1579_v47 = vsel %vm1253_vm15, %v3966_v39, 0.0 }
 0x3d7   : > { %v1633_v58 = vpack.c.bf16 %v1617_v61, %v1617_v61  ;;  %2968 = vpow2.f32 %v1542_v37  ;;  %v1619_v26 = vmul.f32 %v2963_v33, %v3905_v19 }
 0x3d8   : > { %v3969_v44 = vpop.eup %2964 }
 0x3d9   : > { %v1651_v45 = vunpack.c.l.b16 %v1633_v58  ;;  %v1573_v46 = vsel %vm1253_vm15, %v3969_v44, 0.0  ;;  %v1635_v9 = vpack.c.bf16 %v1619_v26, %v1619_v26 }
 0x3da   : > { %1574 = vadd.xlane.f32.xlu2 %v1573_v46  ;;  %1580 = vadd.xlane.f32.xlu0 %v1579_v47 }
 0x3db   : > { %v1652_v25 = vpack.c.b16 %v1651_v45, %v1650_v34  ;;  %v1676_v57 = vunpack.c.l.b16 %v1635_v9 }
 0x3dc   : > { %v2967_v50 = vpop.eup %2966 }
 0x3dd   : > { %v1618_v4 = vmul.f32 %v2967_v50, %v3919_v30  ;;  %2672 = vmatmul.msk.bf16.vlgmr.msrb.gmra.mxu2 %vm1253_vm15, %v1652_v25  ;;  %v1488_v5 = vpop.xlane.xlu1 %1487  ;;  %v3978_v8 = vpop.eup %2968 }
 0x3de   : > { %v1514_v19 = vsub.f32 %v3896_v13, %v1488_v5  ;;  %v1585_v60 = vsel %vm1253_vm15, %v3978_v8, 0.0  ;;  %v1519_v13 = vsub.f32 %v3899_v15, %v3947_v0 }
 0x3df   : > { %v1634_v51 = vpack.c.bf16 %v1618_v4, %v1618_v4 }
 0x3e0   : > { %v1540_v54 = vmul.f32 1.442695, %v1514_v19  ;;  %v1550_v63 = vmul.f32 1.442695, %v1519_v13 }
 0x3e1   : > { %v1675_v59 = vunpack.c.l.b16 %v1634_v51 }
 0x3e2   : > { %2970 = vpow2.f32 %v1540_v54  ;;  %1586 = vadd.xlane.f32.xlu0 %v1585_v60 }
 0x3e3   : > { %v1677_v62 = vpack.c.b16 %v1676_v57, %v1675_v59  ;;  %2972 = vpow2.f32 %v1550_v63 }
 0x3e5   : > { %2673 = vmatmul.msk.bf16.vlgmr.msrb.gmra.mxu3 %vm1253_vm15, %v1677_v62 }
 0x3e8   : > { %v3984_v30 = vpop.eup %2970 }
 0x3e9   : > { %v1582_v49 = vsel %vm1253_vm15, %v3984_v30, 0.0  ;;  %v3996_v6 = vpop.eup %2972 }
 0x3ea   : > { %1583 = vadd.xlane.f32.xlu1 %v1582_v49  ;;  %v1597_v1 = vsel %vm1253_vm15, %v3996_v6, 0.0 }
 0x3f2   : > { %1803 = vrot.lane.b32.xlu2 %v3840_v7, %s3365_s24 }
 0x3f6   : > { %1828 = vrot.lane.b32.xlu0 %v3846_v20, %s3365_s24 }
 0x403   : > { %1778 = vrot.lane.b32.xlu1 %v3834_v55, %s3365_s24 }
 0x41b   : > { %1598 = vadd.xlane.f32.xlu2 %v1597_v1  ;;  %v1566_v7 = vpop.xlane.xlu1 %1565 }
 0x41c   : > { %2974 = vrcp.f32 %v1566_v7 }
 0x422   : > { %v2975_v20 = vpop.eup %2974 }
 0x423   : > { %v1620_v55 = vmul.f32 %v2975_v20, %v3926_v38 }
 0x425   : > { %v1636_v0 = vpack.c.bf16 %v1620_v55, %v1620_v55 }
 0x427   : > { %v1700_v53 = vunpack.c.l.b16 %v1636_v0 }
 0x42b   : > { %v1578_v16 = vpop.xlane.xlu1 %1577 }
 0x42d   : > { %v1590_v11 = vpop.xlane.xlu0 %1589 }
 0x435   : > { %v1593_v12 = vpop.xlane.xlu0 %1592 }
 0x43d   : > { %v1569_v14 = vpop.xlane.xlu0 %1568  ;;  %v1596_v50 = vpop.xlane.xlu1 %1595 }
 0x43e   : > { %2976 = vrcp.f32 %v1569_v14 }
 0x43f   : > { %2978 = vrcp.f32 %v1578_v16 }
 0x440   : > { %2980 = vrcp.f32 %v1593_v12 }
 0x444   : > { %v2977_v17 = vpop.eup %2976 }
 0x445   : > { %v1572_v15 = vpop.xlane.xlu0 %1571  ;;  %v1621_v21 = vmul.f32 %v2977_v17, %v3949_v3  ;;  %v2979_v28 = vpop.eup %2978 }
 0x446   : > { %2982 = vrcp.f32 %v1572_v15  ;;  %v2981_v31 = vpop.eup %2980  ;;  %v1624_v37 = vmul.f32 %v2979_v28, %v3932_v48 }
 0x447   : > { %v1637_v22 = vpack.c.bf16 %v1621_v21, %v1621_v21  ;;  %2984 = vrcp.f32 %v1590_v11  ;;  %v1629_v23 = vmul.f32 %v2981_v31, %v3943_v56 }
 0x448   : > { %v1640_v46 = vpack.c.bf16 %v1624_v37, %v1624_v37 }
 0x449   : > { %v1701_v2 = vunpack.c.l.b16 %v1637_v22  ;;  %v1645_v33 = vpack.c.bf16 %v1629_v23, %v1629_v23 }
 0x44a   : > { %v1750_v5 = vunpack.c.l.b16 %v1640_v46 }
 0x44b   : > { %v1702_v29 = vpack.c.b16 %v1701_v2, %v1700_v53  ;;  %v1801_v9 = vunpack.c.l.b16 %v1645_v33 }
 0x44c   : > { %v2983_v36 = vpop.eup %2982 }
 0x44d   : > { %v1575_v32 = vpop.xlane.xlu2 %1574  ;;  %v1581_v35 = vpop.xlane.xlu0 %1580  ;;  %2674 = vmatmul.msk.bf16.vlgmr.msra.gmra.mxu0 %vm1253_vm15, %v1702_v29  ;;  %v1622_v3 = vmul.f32 %v2983_v36, %v3960_v27 }
 0x44e   : > { %2986 = vrcp.f32 %v1575_v32  ;;  %v2985_v38 = vpop.eup %2984 }
 0x44f   : > { %2988 = vrcp.f32 %v1581_v35  ;;  %v1628_v61 = vmul.f32 %v2985_v38, %v3937_v52  ;;  %v1638_v34 = vpack.c.bf16 %v1622_v3, %v1622_v3 }
 0x451   : > { %v1644_v47 = vpack.c.bf16 %v1628_v61, %v1628_v61  ;;  %v1725_v4 = vunpack.c.l.b16 %v1638_v34 }
 0x453   : > { %v1800_v52 = vunpack.c.l.b16 %v1644_v47  ;;  %v2755_v47 = vld [vmem:[%s3652_s2 + $0x18] sm:$0xff] }
 0x454   : > { %v2987_v40 = vpop.eup %2986  ;;  %1958 = vmatpush.bf16.msrb.mxu2 %v2755_v47 }
 0x455   : > { %v2989_v58 = vpop.eup %2988  ;;  %v1623_v26 = vmul.f32 %v2987_v40, %v3969_v44  ;;  %v1804_v45 = vpop.permute.xlu2 %1803  ;;  %v1802_v54 = vpack.c.b16 %v1801_v9, %v1800_v52 }
 0x456   : > { %v1625_v25 = vmul.f32 %v2989_v58, %v3966_v39  ;;  %1816 = vmatpush.bf16.msrb.mxu0 %v1804_v45  ;;  %v1587_v44 = vpop.xlane.xlu0 %1586 }
 0x457   : > { %v1639_v56 = vpack.c.bf16 %v1623_v26, %v1623_v26 }
 0x458   : > { %v1641_v27 = vpack.c.bf16 %v1625_v25, %v1625_v25  ;;  %v2754_v25 = vld [vmem:[%s3652_s2 + $0x10] sm:$0xff] }
 0x459   : > { %v1726_v48 = vunpack.c.l.b16 %v1639_v56  ;;  %1959 = vmatpush.bf16.msrb.mxu2 %v2754_v25  ;;  %v2752_v56 = vld [vmem:[%s3652_s2] sm:$0xff] }
 0x45a   : > { %v1751_v19 = vunpack.c.l.b16 %v1641_v27 }
 0x45b   : > { %v1727_v51 = vpack.c.b16 %v1726_v48, %v1725_v4 }
 0x45c   : > { %v1752_v57 = vpack.c.b16 %v1751_v19, %v1750_v5 }
 0x45d   : > { %2675 = vmatmul.msk.bf16.vlgmr.msrb.gmra.mxu1 %vm1253_vm15, %v1727_v51  ;;  %2678 = vmatmul.msk.bf16.vlgmr.msrb.gmra.mxu0 %vm1253_vm15, %v1802_v54  ;;  %v1584_v39 = vpop.xlane.xlu1 %1583 }
 0x45e   : > { %2676 = vmatmul.msk.bf16.vlgmr.msra.gmra.mxu2 %vm1253_vm15, %v1752_v57  ;;  %2990 = vrcp.f32 %v1584_v39 }
 0x45f   : > { %2992 = vrcp.f32 %v1587_v44 }
 0x460   : > { %2994 = vrcp.f32 %v1596_v50  ;;  %v1668_v2 = vpop.f32.mrf.mxu2  ;;  %v2753_v50 = vld [vmem:[%s3652_s2 + $0x8] sm:$0xff] }
 0x461   : > { %1960 = vmatpush.bf16.msrb.mxu2 %v2753_v50 }
 0x464   : > { %v2991_v59 = vpop.eup %2990 }
 0x465   : > { %v2993_v62 = vpop.eup %2992  ;;  %v1626_v49 = vmul.f32 %v2991_v59, %v3984_v30  ;;  %1961 = vmatpush.bf16.msrb.mxu2 %v2752_v56 }
 0x466   : > { %v1627_v13 = vmul.f32 %v2993_v62, %v3978_v8  ;;  %v2995_v55 = vpop.eup %2994 }
 0x467   : > { %v1642_v63 = vpack.c.bf16 %v1626_v49, %v1626_v49  ;;  %v1630_v16 = vmul.f32 %v2995_v55, %v3953_v10 }
 0x468   : > { %v1829_v60 = vpop.permute.xlu0 %1828  ;;  %v1643_v1 = vpack.c.bf16 %v1627_v13, %v1627_v13  ;;  %v1670_v31 = vpop.f32.mrf.mxu2 }
 0x469   : > { %1841 = vmatpush.bf16.msra.mxu1 %v1829_v60  ;;  %v1775_v11 = vunpack.c.l.b16 %v1642_v63  ;;  %v1646_v15 = vpack.c.bf16 %v1630_v16, %v1630_v16  ;;  %v1693_v23 = vpop.f32.mrf.mxu3 }
 0x46a   : > { %v1776_v12 = vunpack.c.l.b16 %v1643_v1 }
 0x46b   : > { %v1825_v0 = vunpack.c.l.b16 %v1646_v15 }
 0x46c   : > { %v1777_v14 = vpack.c.b16 %v1776_v12, %v1775_v11 }
 0x471   : > { %v1695_v40 = vpop.f32.mrf.mxu3 }
 0x475   : > { %v1779_v7 = vpop.permute.xlu1 %1778 }
 0x476   : > { %1791 = vmatpush.bf16.msra.mxu3 %v1779_v7 }
 0x479   : > { %2677 = vmatmul.msk.bf16.vlgmr.msra.gmra.mxu3 %vm1253_vm15, %v1777_v14 }
 0x48e   : > { %v1599_v20 = vpop.xlane.xlu2 %1598 }
 0x48f   : > { %2996 = vrcp.f32 %v1599_v20 }
 0x495   : > { %v2997_v17 = vpop.eup %2996 }
 0x496   : > { %v1631_v30 = vmul.f32 %v2997_v17, %v3996_v6 }
 0x498   : > { %v1647_v8 = vpack.c.bf16 %v1631_v30, %v1631_v30 }
 0x49a   : > { %v1826_v21 = vunpack.c.l.b16 %v1647_v8 }
 0x49c   : > { %v1827_v22 = vpack.c.b16 %v1826_v21, %v1825_v0 }
 0x49e   : > { %2679 = vmatmul.msk.bf16.vlgmr.msra.gmra.mxu1 %vm1253_vm15, %v1827_v22  ;;  %v2919_v22 = vld [vmem:[%s916_s23] ss:$0 sm:$0xff] }
 0x4ca   : > { %v1718_v53 = vpop.f32.mrf.mxu0 }
 0x4d2   : > { %v1720_v28 = vpop.f32.mrf.mxu0 }
 0x4d3   : > { %v2885_v29 = vpack.i.bf16 %v1720_v28, %v1718_v53 }
 0x4d5   : > { %2886 = vrot.lane.b32.xlu1 %v2885_v29, %s3366_s16 }
 0x4da   : > { %v1818_v32 = vpop.f32.mrf.mxu0  ;;  %v1743_v38 = vpop.f32.mrf.mxu1 }
 0x4e1   : > { %v1768_v35 = vpop.f32.mrf.mxu2 }
 0x4e2   : > { %v1820_v10 = vpop.f32.mrf.mxu0  ;;  %v1745_v37 = vpop.f32.mrf.mxu1 }
 0x4e3   : > { %v2895_v36 = vpack.i.bf16 %v1820_v10, %v1818_v32  ;;  %v2900_v61 = vpack.i.bf16 %v1745_v37, %v1743_v38 }
 0x4e5   : > { %2896 = vrot.lane.b32.xlu1 %v2895_v36, %s3367_s10 }
 0x4e9   : > { %v1770_v6 = vpop.f32.mrf.mxu2 }
 0x4ea   : > { %v2890_v3 = vpack.i.bf16 %v1770_v6, %v1768_v35 }
 0x4ec   : > { %2891 = vrot.lane.b32.xlu0 %v2890_v3, %s3368_s14 }
 0x4f4   : > { %2901 = vrot.lane.b32.xlu0 %v2900_v61, %s3366_s16 }
 0x4fc   : > { %v1793_v33 = vpop.f32.mrf.mxu3 }
 0x504   : > { %v1795_v58 = vpop.f32.mrf.mxu3 }
 0x505   : > { %v2905_v34 = vpack.i.bf16 %v1795_v58, %v1793_v33 }
 0x507   : > { %2906 = vrot.lane.b32.xlu2 %v2905_v34, %s3368_s14 }
 0x51b   : > { %v1843_v26 = vpop.f32.mrf.mxu1 }
 0x523   : > { %v1845_v45 = vpop.f32.mrf.mxu1 }
 0x524   : > { %v2910_v46 = vpack.i.bf16 %v1845_v45, %v1843_v26 }
 0x526   : > { %2911 = vrot.lane.b32.xlu1 %v2910_v46, %s3367_s10 }
 0x547   : > { %v2887_v9 = vpop.permute.xlu1 %2886 }
 0x548   : > { %v2889_v27 = vunpack.i.h.bf16 %v2887_v9  ;;  %v2888_v4 = vunpack.i.l.bf16 %v2887_v9 }
 0x54a   : > { %v1897_v51 = vsel %vm1253_vm15, %v1670_v31, %v2889_v27  ;;  %v1896_v54 = vsel %vm1253_vm15, %v1668_v2, %v2888_v4 }
 0x557   : > { %v2897_v48 = vpop.permute.xlu1 %2896 }
 0x558   : > { %v2899_v57 = vunpack.i.h.bf16 %v2897_v48  ;;  %v2898_v39 = vunpack.i.l.bf16 %v2897_v48 }
 0x55e   : > { %v2892_v5 = vpop.permute.xlu0 %2891 }
 0x55f   : > { %v2894_v52 = vunpack.i.h.bf16 %v2892_v5  ;;  %v2893_v19 = vunpack.i.l.bf16 %v2892_v5 }
 0x561   : > { %v1902_v44 = vsel %vm1900_vm0, %v1897_v51, %v2894_v52  ;;  %v1901_v59 = vsel %vm1900_vm0, %v1896_v54, %v2893_v19  ;;  %v2907_v11 = vpop.permute.xlu2 %2906  ;;  %v2759_v19 = vld [vmem:[%s3659_s18 + $0x18] sm:$0xff]  ;;  %v2758_v51 = vld [vmem:[%s3659_s18 + $0x10] sm:$0xff]  ;;  %v2757_v54 = vld [vmem:[%s3659_s18 + $0x8] sm:$0xff] }
 0x562   : > { %v1907_v60 = vsel %vm1905_vm2, %v1902_v44, %v2899_v57  ;;  %v1906_v62 = vsel %vm1905_vm2, %v1901_v59, %v2898_v39  ;;  %v2909_v14 = vunpack.i.h.bf16 %v2907_v11  ;;  %v2908_v20 = vunpack.i.l.bf16 %v2907_v11  ;;  %2129 = vmatpush.bf16.msrb.mxu3 %v2759_v19  ;;  %v2756_v59 = vld [vmem:[%s3659_s18] sm:$0xff]  ;;  %v2762_v19 = vld [vmem:[%s3662_s17 + $0x10] sm:$0xff] }
 0x563   : > { %v1910_v49 = vpack.c.bf16 %v1907_v60, %v1906_v62 }
 0x565   : > { %2696 = vmatmul.msk.bf16.vlgmr.msrb.gmra.mxu2 %vm947_vm1, %v1910_v49 }
 0x566   : > { %v2902_v13 = vpop.permute.xlu0 %2901  ;;  %2130 = vmatpush.bf16.msrb.mxu3 %v2758_v51  ;;  %v2760_v51 = vld [vmem:[%s3662_s17] sm:$0xff] }
 0x567   : > { %v2904_v63 = vunpack.i.h.bf16 %v2902_v13  ;;  %v2903_v1 = vunpack.i.l.bf16 %v2902_v13 }
 0x569   : > { %v1899_v12 = vsel %vm1253_vm15, %v1695_v40, %v2904_v63  ;;  %v1898_v7 = vsel %vm1253_vm15, %v1693_v23, %v2903_v1 }
 0x56a   : > { %v1903_v15 = vsel %vm1900_vm0, %v1898_v7, %v2908_v20  ;;  %v1904_v30 = vsel %vm1900_vm0, %v1899_v12, %v2909_v14  ;;  %2131 = vmatpush.bf16.msrb.mxu3 %v2757_v54 }
 0x56e   : > { %2132 = vmatpush.bf16.msrb.mxu3 %v2756_v59 }
 0x598   : > { %v2912_v55 = vpop.permute.xlu1 %2911 }
 0x599   : > { %v2914_v16 = vunpack.i.h.bf16 %v2912_v55  ;;  %v2913_v17 = vunpack.i.l.bf16 %v2912_v55 }
 0x59b   : > { %v1908_v8 = vsel %vm1905_vm2, %v1903_v15, %v2913_v17  ;;  %v1909_v0 = vsel %vm1905_vm2, %v1904_v30, %v2914_v16  ;;  %v2920_v30 = vld [vmem:[%s919_s19] ss:$0 sm:$0xff] }
 0x59c   : > { %v1911_v21 = vpack.c.bf16 %v1909_v0, %v1908_v8 }
 0x59e   : > { %2697 = vmatmul.msk.bf16.gmra.mxu2 %vm947_vm1, %v1911_v21 }
 0x5e8   : > { %v1963_v53 = vpop.f32.mrf.mxu2 }
 0x5e9   : > { %v1964_v2 = vadd.f32 %v2919_v22, %v1963_v53 }
 0x5eb   : > { %v1973_v28 = vadd.f32 %v1964_v2, %v3776_v42 }
 0x5ed   : > { %v1979_v29 = vsel %vm947_vm1, %v1973_v28, 0.0 }
 0x5ee   : > { %1980 = vadd.xlane.f32.xlu0 %v1979_v29 }
 0x5f0   : > { %v1965_v31 = vpop.f32.mrf.mxu2 }
 0x5f1   : > { %v1966_v32 = vadd.f32 %v2919_v22, %v1965_v31 }
 0x5f3   : > { %v1974_v35 = vadd.f32 %v1966_v32, %v3778_v43 }
 0x5f5   : > { %v1982_v10 = vsel %vm947_vm1, %v1974_v35, 0.0 }
 0x5f6   : > { %1983 = vadd.xlane.f32.xlu1 %v1982_v10 }
 0x621   : > { %v1968_v36 = vpop.f32.mrf.mxu2 }
 0x622   : > { %v1969_v38 = vadd.f32 %v2919_v22, %v1968_v36 }
 0x624   : > { %v1975_v6 = vadd.f32 %v1969_v38, %v3772_v41 }
 0x626   : > { %v1985_v23 = vsel %vm947_vm1, %v1975_v6, 0.0 }
 0x627   : > { %1986 = vadd.xlane.f32.xlu2 %v1985_v23 }
 0x629   : > { %v1970_v3 = vpop.f32.mrf.mxu2 }
 0x62a   : > { %v1971_v37 = vadd.f32 %v2919_v22, %v1970_v3  ;;  %v2921_v22 = vld [vmem:[%s4251_s25] ss:$0 sm:$0xff] }
 0x62c   : > { %v1976_v42 = vadd.f32 %v1971_v37, %v3774_v24 }
 0x62e   : > { %v1988_v61 = vsel %vm947_vm1, %v1976_v42, 0.0 }
 0x62f   : > { %1989 = vadd.xlane.f32.xlu0 %v1988_v61 }
 0x661   : > { %v1981_v40 = vpop.xlane.xlu0 %1980 }
 0x662   : > { %v1991_v43 = vmul.f32 %v1981_v40, %v3719_v18 }
 0x664   : > { %v1995_v33 = vsub.f32 %v1973_v28, %v1991_v43 }
 0x666   : > { %v1999_v58 = vmul.f32 %v1995_v33, %v1995_v33 }
 0x668   : > { %v2003_v34 = vsel %vm947_vm1, %v1999_v58, 0.0 }
 0x669   : > { %v1984_v26 = vpop.xlane.xlu1 %1983  ;;  %2004 = vadd.xlane.f32.xlu1 %v2003_v34 }
 0x66a   : > { %v1992_v41 = vmul.f32 %v1984_v26, %v3719_v18 }
 0x66c   : > { %v1996_v45 = vsub.f32 %v1974_v35, %v1992_v41 }
 0x66e   : > { %v2000_v46 = vmul.f32 %v1996_v45, %v1996_v45 }
 0x670   : > { %v2006_v47 = vsel %vm947_vm1, %v2000_v46, 0.0 }
 0x671   : > { %2007 = vadd.xlane.f32.xlu0 %v2006_v47 }
 0x69a   : > { %v1987_v24 = vpop.xlane.xlu2 %1986 }
 0x69b   : > { %v1993_v25 = vmul.f32 %v1987_v24, %v3719_v18 }
 0x69d   : > { %v4054_v50 = vsub.f32 %v1975_v6, %v1993_v25 }
 0x69f   : > { %v2001_v56 = vmul.f32 %v4054_v50, %v4054_v50 }
 0x6a1   : > { %v2009_v9 = vsel %vm947_vm1, %v2001_v56, 0.0 }
 0x6a2   : > { %2010 = vadd.xlane.f32.xlu1 %v2009_v9  ;;  %v1990_v27 = vpop.xlane.xlu0 %1989 }
 0x6a3   : > { %v1994_v4 = vmul.f32 %v1990_v27, %v3719_v18 }
 0x6a5   : > { %v4060_v48 = vsub.f32 %v1976_v42, %v1994_v4 }
 0x6a7   : > { %v2002_v5 = vmul.f32 %v4060_v48, %v4060_v48 }
 0x6a9   : > { %v2012_v52 = vsel %vm947_vm1, %v2002_v5, 0.0 }
 0x6aa   : > { %2013 = vadd.xlane.f32.xlu0 %v2012_v52  ;;  %v2763_v52 = vld [vmem:[%s3662_s17 + $0x18] sm:$0xff] }
 0x6ab   : > { %2196 = vmatpush.bf16.msra.mxu0 %v2763_v52 }
 0x6af   : > { %2197 = vmatpush.bf16.msra.mxu0 %v2762_v19 }
 0x6dc   : > { %v2005_v57 = vpop.xlane.xlu1 %2004 }
 0x6dd   : > { %v2015_v39 = vmul.f32 %v2005_v57, %v3719_v18 }
 0x6df   : > { %v2019_v44 = vadd.f32 1e-08, %v2015_v39 }
 0x6e1   : > { %2998 = vrsqrt.f32 %v2019_v44  ;;  %vm2029_vm4 = vweird.f32 %v2019_v44 }
 0x6e4   : > { %v2008_v60 = vpop.xlane.xlu0 %2007 }
 0x6e5   : > { %v2016_v62 = vmul.f32 %v2008_v60, %v3719_v18 }
 0x6e7   : > { %v2999_v49 = vpop.eup %2998  ;;  %v2020_v13 = vadd.f32 1e-08, %v2016_v62 }
 0x6e8   : > { %v2024_v63 = vmul.f32 %v2999_v49, %v2019_v44  ;;  %vm2030_vm3 = vweird.f32 %v2999_v49 }
 0x6e9   : > { %3000 = vrsqrt.f32 %v2020_v13  ;;  %vm2031_vm5 = vmor %vm2029_vm4, %vm2030_vm3  ;;  %vm2039_vm7 = vweird.f32 %v2020_v13 }
 0x6ea   : > { %v2025_v1 = vmul.f32 %v2999_v49, %v2024_v63 }
 0x6ec   : > { %v2026_v11 = vmul.f32 0.5, %v2025_v1 }
 0x6ee   : > { %v2027_v12 = vsub.f32 1.5, %v2026_v11 }
 0x6ef   : > { %v3001_v7 = vpop.eup %3000 }
 0x6f0   : > { %v2028_v14 = vmul.f32 %v2999_v49, %v2027_v12  ;;  %v2034_v20 = vmul.f32 %v3001_v7, %v2020_v13  ;;  %vm2040_vm6 = vweird.f32 %v3001_v7 }
 0x6f1   : > { %vm2041_vm8 = vmor %vm2039_vm7, %vm2040_vm6 }
 0x6f2   : > { %v2035_v55 = vmul.f32 %v3001_v7, %v2034_v20  ;;  %v2032_v16 = vsel %vm2031_vm5, %v2999_v49, %v2028_v14  ;;  %v2923_v14 = vld [vmem:[%s925_s5] ss:$0 sm:$0xff]  ;;  %s4254_s5 = sld [smem:[#allocation41_spill]] (!%p2734_p3) }
 0x6f3   : > { %v2063_v8 = vmul.f32 %v2032_v16, %v1995_v33 }
 0x6f4   : > { %v2036_v17 = vmul.f32 0.5, %v2035_v55 }
 0x6f5   : > { %v2070_v53 = vmul.f32 %v2920_v30, %v2063_v8 }
 0x6f6   : > { %v2037_v15 = vsub.f32 1.5, %v2036_v17 }
 0x6f7   : > { %v4078_v29 = vadd.f32 %v2921_v22, %v2070_v53 }
 0x6f8   : > { %v2038_v0 = vmul.f32 %v3001_v7, %v2037_v15 }
 0x6fa   : > { %v2042_v21 = vsel %vm2041_vm8, %v3001_v7, %v2038_v0 }
 0x6fb   : > { %v2064_v2 = vmul.f32 %v2042_v21, %v1996_v45 }
 0x6fd   : > { %v2071_v28 = vmul.f32 %v2920_v30, %v2064_v2 }
 0x6ff   : > { %v4080_v31 = vadd.f32 %v2921_v22, %v2071_v28 }
 0x701   : > { %v2081_v32 = vpack.c.bf16 %v4080_v31, %v4078_v29 }
 0x703   : > { %2714 = vmatmul.msk.bf16.vlgmr.msrb.gmra.mxu3 %vm947_vm1, %v2081_v32 }
 0x715   : > { %v2011_v35 = vpop.xlane.xlu1 %2010 }
 0x716   : > { %v2017_v10 = vmul.f32 %v2011_v35, %v3719_v18 }
 0x718   : > { %v2021_v36 = vadd.f32 1e-08, %v2017_v10 }
 0x71a   : > { %3002 = vrsqrt.f32 %v2021_v36  ;;  %vm2049_vm10 = vweird.f32 %v2021_v36 }
 0x71d   : > { %v2014_v38 = vpop.xlane.xlu0 %2013 }
 0x71e   : > { %v2018_v6 = vmul.f32 %v2014_v38, %v3719_v18 }
 0x720   : > { %v3003_v23 = vpop.eup %3002  ;;  %v2022_v3 = vadd.f32 1e-08, %v2018_v6 }
 0x721   : > { %v2044_v37 = vmul.f32 %v3003_v23, %v2021_v36  ;;  %vm2050_vm9 = vweird.f32 %v3003_v23 }
 0x722   : > { %3004 = vrsqrt.f32 %v2022_v3  ;;  %vm2051_vm11 = vmor %vm2049_vm10, %vm2050_vm9  ;;  %vm2059_vm13 = vweird.f32 %v2022_v3 }
 0x723   : > { %v2045_v42 = vmul.f32 %v3003_v23, %v2044_v37 }
 0x725   : > { %v2046_v61 = vmul.f32 0.5, %v2045_v42 }
 0x727   : > { %v2047_v40 = vsub.f32 1.5, %v2046_v61 }
 0x728   : > { %v3005_v43 = vpop.eup %3004 }
 0x729   : > { %v2048_v33 = vmul.f32 %v3003_v23, %v2047_v40  ;;  %v2054_v58 = vmul.f32 %v3005_v43, %v2022_v3  ;;  %vm2060_vm12 = vweird.f32 %v3005_v43 }
 0x72a   : > { %vm2061_vm14 = vmor %vm2059_vm13, %vm2060_vm12 }
 0x72b   : > { %v2055_v34 = vmul.f32 %v3005_v43, %v2054_v58  ;;  %v2052_v26 = vsel %vm2051_vm11, %v3003_v23, %v2048_v33 }
 0x72c   : > { %v2065_v46 = vmul.f32 %v2052_v26, %v4054_v50  ;;  %v2761_v50 = vld [vmem:[%s3662_s17 + $0x8] sm:$0xff] }
 0x72d   : > { %v2056_v41 = vmul.f32 0.5, %v2055_v34  ;;  %2198 = vmatpush.bf16.msra.mxu0 %v2761_v50 }
 0x72e   : > { %v2072_v56 = vmul.f32 %v2920_v30, %v2065_v46 }
 0x72f   : > { %v2057_v45 = vsub.f32 1.5, %v2056_v41 }
 0x730   : > { %v2079_v27 = vadd.f32 %v2921_v22, %v2072_v56 }
 0x731   : > { %v2058_v47 = vmul.f32 %v3005_v43, %v2057_v45  ;;  %2199 = vmatpush.bf16.msra.mxu0 %v2760_v51 }
 0x733   : > { %v2062_v24 = vsel %vm2061_vm14, %v3005_v43, %v2058_v47 }
 0x734   : > { %v2066_v25 = vmul.f32 %v2062_v24, %v4060_v48  ;;  %v2922_v48 = vld [vmem:[%s922_s13] ss:$0 sm:$0xff] }
 0x736   : > { %v2073_v9 = vmul.f32 %v2920_v30, %v2066_v25 }
 0x738   : > { %v2080_v4 = vadd.f32 %v2921_v22, %v2073_v9 }
 0x73a   : > { %v2082_v5 = vpack.c.bf16 %v2080_v4, %v2079_v27 }
 0x73c   : > { %2715 = vmatmul.msk.bf16.gmra.mxu3 %vm947_vm1, %v2082_v5 }
 0x786   : > { %v2134_v54 = vpop.f32.mrf.mxu3 }
 0x787   : > { %v2135_v57 = vadd.f32 %v2922_v48, %v2134_v54 }
 0x789   : > { %v2144_v59 = vmax.f32 %v2135_v57, 0.0 }
 0x78e   : > { %v2136_v39 = vpop.f32.mrf.mxu3 }
 0x78f   : > { %v2137_v44 = vadd.f32 %v2922_v48, %v2136_v39 }
 0x791   : > { %v2145_v60 = vmax.f32 %v2137_v44, 0.0 }
 0x793   : > { %v2148_v62 = vpack.c.bf16 %v2145_v60, %v2144_v59 }
 0x795   : > { %2732 = vmatmul.msk.bf16.vlgmr.msra.gmra.mxu0 %vm947_vm1, %v2148_v62 }
 0x7bf   : > { %v2139_v49 = vpop.f32.mrf.mxu3 }
 0x7c0   : > { %v2140_v13 = vadd.f32 %v2922_v48, %v2139_v49 }
 0x7c2   : > { %v2146_v11 = vmax.f32 %v2140_v13, 0.0 }
 0x7c7   : > { %v2141_v63 = vpop.f32.mrf.mxu3 }
 0x7c8   : > { %v2142_v1 = vadd.f32 %v2922_v48, %v2141_v63 }
 0x7ca   : > { %v2147_v12 = vmax.f32 %v2142_v1, 0.0 }
 0x7cc   : > { %v2149_v7 = vpack.c.bf16 %v2147_v12, %v2146_v11 }
 0x7ce   : > { %2733 = vmatmul.msk.bf16.gmra.mxu0 %vm947_vm1, %v2149_v7 }
 0x812   : > { %v2201_v20 = vpop.f32.mrf.mxu0 }
 0x813   : > { %v2202_v55 = vadd.f32 %v2923_v14, %v2201_v20 }
 0x815   : > { %v2211_v16 = vadd.f32 %v2202_v55, %v4078_v29 }
 0x817   : > { %2215 = vst.msk [vmem:[#allocation2] sm:$0xff] %vm947_vm1, %v2211_v16 }
 0x81a   : > { %v2203_v17 = vpop.f32.mrf.mxu0 }
 0x81b   : > { %v2204_v15 = vadd.f32 %v2923_v14, %v2203_v17 }
 0x81d   : > { %v2212_v30 = vadd.f32 %v2204_v15, %v4080_v31 }
 0x81f   : > { %2216 = vst.msk [vmem:[#allocation2 + $0x8] sm:$0xff] %vm947_vm1, %v2212_v30 }
 0x84b   : > { %v2206_v8 = vpop.f32.mrf.mxu0 }
 0x84c   : > { %v2207_v0 = vadd.f32 %v2923_v14, %v2206_v8 }
 0x84e   : > { %v2213_v21 = vadd.f32 %v2207_v0, %v2079_v27 }
 0x850   : > { %2217 = vst.msk [vmem:[#allocation2 + $0x10] sm:$0xff] %vm947_vm1, %v2213_v21 }
 0x853   : > { %v2208_v22 = vpop.f32.mrf.mxu0 }
 0x854   : > { %v2209_v53 = vadd.f32 %v2923_v14, %v2208_v22  ;;  %2222 = sbr.rel (%p2734_p3) target bundleno = 2415 (0x96f), region = 128 }
 0x856   : > { %v2214_v2 = vadd.f32 %v2209_v53, %v2080_v4 }
 0x858   : > { %2218 = vst.msk [vmem:[#allocation2 + $0x18] sm:$0xff] %vm947_vm1, %v2214_v2 }
 0x859   : > { %v2231_v28 = vsel %vm947_vm1, %v2213_v21, 0.0  ;;  %v2225_v29 = vsel %vm947_vm1, %v2211_v16, 0.0  ;;  %v2234_v31 = vsel %vm947_vm1, %v2214_v2, 0.0  ;;  %v2228_v32 = vsel %vm947_vm1, %v2212_v30, 0.0  ;;  %v3006_v7 = vld [vmem:[%s4254_s5] ss:$0 sm:$0xff] }
 0x85a   : > { %2232 = vadd.xlane.f32.xlu1 %v2231_v28  ;;  %2226 = vadd.xlane.f32.xlu0 %v2225_v29  ;;  %v3007_v15 = vld [vmem:[%s4255_s7] ss:$0 sm:$0xff] }
 0x862   : > { %2235 = vadd.xlane.f32.xlu1 %v2234_v31  ;;  %2229 = vadd.xlane.f32.xlu0 %v2228_v32 }
 0x8cd   : > { %v2233_v35 = vpop.xlane.xlu1 %2232  ;;  %v2227_v10 = vpop.xlane.xlu0 %2226 }
 0x8ce   : > { %v2239_v36 = vmul.f32 %v2233_v35, %v3719_v18  ;;  %v2237_v38 = vmul.f32 %v2227_v10, %v3719_v18 }
 0x8d0   : > { %v4119_v6 = vsub.f32 %v2213_v21, %v2239_v36  ;;  %v2241_v23 = vsub.f32 %v2211_v16, %v2237_v38 }
 0x8d2   : > { %v2247_v3 = vmul.f32 %v4119_v6, %v4119_v6  ;;  %v2245_v37 = vmul.f32 %v2241_v23, %v2241_v23 }
 0x8d4   : > { %v2255_v42 = vsel %vm947_vm1, %v2247_v3, 0.0  ;;  %v2249_v61 = vsel %vm947_vm1, %v2245_v37, 0.0 }
 0x8d5   : > { %v2236_v40 = vpop.xlane.xlu1 %2235  ;;  %2256 = vadd.xlane.f32.xlu0 %v2255_v42  ;;  %2250 = vadd.xlane.f32.xlu2 %v2249_v61  ;;  %v2230_v43 = vpop.xlane.xlu0 %2229 }
 0x8d6   : > { %v2240_v33 = vmul.f32 %v2236_v40, %v3719_v18  ;;  %v2238_v58 = vmul.f32 %v2230_v43, %v3719_v18 }
 0x8d8   : > { %v4127_v34 = vsub.f32 %v2214_v2, %v2240_v33  ;;  %v4129_v26 = vsub.f32 %v2212_v30, %v2238_v58 }
 0x8da   : > { %v2248_v41 = vmul.f32 %v4127_v34, %v4127_v34  ;;  %v2246_v45 = vmul.f32 %v4129_v26, %v4129_v26 }
 0x8dc   : > { %v2258_v46 = vsel %vm947_vm1, %v2248_v41, 0.0  ;;  %v2252_v47 = vsel %vm947_vm1, %v2246_v45, 0.0 }
 0x8dd   : > { %2259 = vadd.xlane.f32.xlu1 %v2258_v46  ;;  %2253 = vadd.xlane.f32.xlu2 %v2252_v47 }
 0x948   : > { %v2251_v24 = vpop.xlane.xlu2 %2250  ;;  %v2257_v25 = vpop.xlane.xlu0 %2256 }
 0x949   : > { %v2261_v56 = vmul.f32 %v2251_v24, %v3719_v18  ;;  %v2263_v9 = vmul.f32 %v2257_v25, %v3719_v18 }
 0x94b   : > { %v2265_v27 = vadd.f32 1e-08, %v2261_v56  ;;  %v2267_v4 = vadd.f32 1e-08, %v2263_v9 }
 0x94d   : > { %3008 = vrsqrt.f32 %v2265_v27  ;;  %vm2275_vm2 = vweird.f32 %v2265_v27  ;;  %vm2295_vm4 = vweird.f32 %v2267_v4 }
 0x94e   : > { %3010 = vrsqrt.f32 %v2267_v4 }
 0x950   : > { %v2260_v5 = vpop.xlane.xlu1 %2259  ;;  %v2254_v52 = vpop.xlane.xlu2 %2253 }
 0x951   : > { %v2264_v19 = vmul.f32 %v2260_v5, %v3719_v18  ;;  %v2262_v50 = vmul.f32 %v2254_v52, %v3719_v18 }
 0x953   : > { %v3009_v51 = vpop.eup %3008  ;;  %v2268_v54 = vadd.f32 1e-08, %v2264_v19  ;;  %v2266_v48 = vadd.f32 1e-08, %v2262_v50 }
 0x954   : > { %v3011_v57 = vpop.eup %3010  ;;  %v2270_v39 = vmul.f32 %v3009_v51, %v2265_v27  ;;  %vm2276_vm15 = vweird.f32 %v3009_v51 }
 0x955   : > { %v2290_v44 = vmul.f32 %v3011_v57, %v2267_v4  ;;  %3012 = vrsqrt.f32 %v2268_v54  ;;  %vm2296_vm0 = vweird.f32 %v3011_v57  ;;  %vm2277_vm3 = vmor %vm2275_vm2, %vm2276_vm15  ;;  %vm2305_vm8 = vweird.f32 %v2268_v54 }
 0x956   : > { %v2271_v59 = vmul.f32 %v3009_v51, %v2270_v39  ;;  %3014 = vrsqrt.f32 %v2266_v48  ;;  %vm2297_vm5 = vmor %vm2295_vm4, %vm2296_vm0  ;;  %vm2285_vm10 = vweird.f32 %v2266_v48 }
 0x957   : > { %v2291_v60 = vmul.f32 %v3011_v57, %v2290_v44 }
 0x958   : > { %v2272_v62 = vmul.f32 0.5, %v2271_v59 }
 0x959   : > { %v2292_v49 = vmul.f32 0.5, %v2291_v60 }
 0x95a   : > { %v2273_v13 = vsub.f32 1.5, %v2272_v62 }
 0x95b   : > { %v3013_v63 = vpop.eup %3012  ;;  %v2293_v1 = vsub.f32 1.5, %v2292_v49 }
 0x95c   : > { %v3015_v11 = vpop.eup %3014  ;;  %v2274_v12 = vmul.f32 %v3009_v51, %v2273_v13  ;;  %v2300_v18 = vmul.f32 %v3013_v63, %v2268_v54  ;;  %vm2306_vm6 = vweird.f32 %v3013_v63 }
 0x95d   : > { %v2294_v14 = vmul.f32 %v3011_v57, %v2293_v1  ;;  %v2280_v20 = vmul.f32 %v3015_v11, %v2266_v48  ;;  %vm2286_vm7 = vweird.f32 %v3015_v11  ;;  %vm2307_vm9 = vmor %vm2305_vm8, %vm2306_vm6 }
 0x95e   : > { %v2278_v55 = vsel %vm2277_vm3, %v3009_v51, %v2274_v12  ;;  %v2301_v16 = vmul.f32 %v3013_v63, %v2300_v18  ;;  %vm2287_vm11 = vmor %vm2285_vm10, %vm2286_vm7 }
 0x95f   : > { %v2309_v17 = vmul.f32 %v2278_v55, %v2241_v23  ;;  %v2298_v30 = vsel %vm2297_vm5, %v3011_v57, %v2294_v14  ;;  %v2281_v8 = vmul.f32 %v3015_v11, %v2280_v20 }
 0x960   : > { %v2311_v0 = vmul.f32 %v2298_v30, %v4119_v6  ;;  %v2302_v21 = vmul.f32 0.5, %v2301_v16 }
 0x961   : > { %v2316_v22 = vmul.f32 %v3006_v7, %v2309_v17  ;;  %v2282_v53 = vmul.f32 0.5, %v2281_v8 }
 0x962   : > { %v2318_v2 = vmul.f32 %v3006_v7, %v2311_v0  ;;  %v2303_v28 = vsub.f32 1.5, %v2302_v21 }
 0x963   : > { %v2323_v29 = vadd.f32 %v3007_v15, %v2316_v22  ;;  %v2283_v31 = vsub.f32 1.5, %v2282_v53 }
 0x964   : > { %v2325_v32 = vadd.f32 %v3007_v15, %v2318_v2  ;;  %v2304_v35 = vmul.f32 %v3013_v63, %v2303_v28 }
 0x965   : > { %2327 = vst.msk [vmem:[#allocation17] sm:$0xff] %vm947_vm1, %v2323_v29  ;;  %v2284_v10 = vmul.f32 %v3015_v11, %v2283_v31 }
 0x966   : > { %2329 = vst.msk [vmem:[#allocation17 + $0x10] sm:$0xff] %vm947_vm1, %v2325_v32  ;;  %v2308_v36 = vsel %vm2307_vm9, %v3013_v63, %v2304_v35 }
 0x967   : > { %v2312_v38 = vmul.f32 %v2308_v36, %v4127_v34  ;;  %v2288_v6 = vsel %vm2287_vm11, %v3015_v11, %v2284_v10 }
 0x968   : > { %v2310_v23 = vmul.f32 %v2288_v6, %v4129_v26 }
 0x969   : > { %v2319_v3 = vmul.f32 %v3006_v7, %v2312_v38 }
 0x96a   : > { %v2317_v37 = vmul.f32 %v3006_v7, %v2310_v23 }
 0x96b   : > { %v2326_v42 = vadd.f32 %v3007_v15, %v2319_v3 }
 0x96c   : > { %v2324_v61 = vadd.f32 %v3007_v15, %v2317_v37 }
 0x96d   : > { %2330 = vst.msk [vmem:[#allocation17 + $0x18] sm:$0xff] %vm947_vm1, %v2326_v42 }
 0x96e   : > { %2328 = vst.msk [vmem:[#allocation17 + $0x8] sm:$0xff] %vm947_vm1, %v2324_v61 }
 0x96f PF: > { %p2819_p4 = scmp.eq.s32.totalorder %s3561_s9, 1  ;;  %s4256_s30 = sld [smem:[#allocation43_spill]] }
 0x970   : > { %s3369_s24 = smov [#allocation17]   ;;  %s3370_s10 = smov 128  }
 0x971   : > { %s2339_s16 = sshll.u32 %s3369_s24, 4  ;;  %s3371_s14 = smov 8   ;;  %s2340_s16 = int_to_ptr.vmem [resolvable:$true] %s2339_s16 }
 0x975   : > { %s2341_s26 = sshll.u32 %s4256_s30, 4  ;;  %s2342_s26 = int_to_ptr.hbm [resolvable:$true] %s2341_s26 }
 0x976   : > { %2787 = dma.vmem_to_hbm [thread:$0]  (%p2819_p4), %s2340_s16, 512, %s2342_s26, [#allocation5], %s3370_s10, %s3370_s10, %s3371_s14  }
 0x977   : > { %3329 = dma.done.wait (%p2819_p4), [#allocation5], 512  }
 0x978   : > { %3331 = vsyncadd (%p2819_p4), [#allocation5], 4294966784 }
 0x979 PF: > { %s41_s29 = sadd.s32 1, %s3354_s29   ;;  %s4257_s24 = sld [smem:[#allocation24_spill]] }
 0x97a   : > { %p38_p5 = scmp.ge.s32.totalorder %s41_s29, 4   ;;  %s4258_s25 = sld [smem:[#allocation25_spill]] }
 0x97b   : > { %s4259_s26 = sld [smem:[#allocation28_spill]] }
 0x97c   : > { %s4260_s27 = sld [smem:[#allocation26_spill]]  ;;  %40 = sbr.rel (!%p38_p5) target bundleno = 28 (0x1c), region = 233 }
 0x97d   : > { %s4261_s28 = sld [smem:[#allocation27_spill]] }
 0x981   :  { %2358 = vsyncpa [#allocation4], 1 }
 0x982   :  { %2360 = vsyncpa [#allocation4 + $0x1], 1 }
 0x983   :  { %2361 = vsyncpa [#allocation7], 1 }
 0x984   :  { %2363 = vsyncpa [#allocation7 + $0x1], 1 }
 0x985   :  { %2364 = vsyncpa [#allocation10], 1 }
 0x986   :  { %2366 = vsyncpa [#allocation10 + $0x1], 1 }
 0x987   :  { %2367 = vsyncpa [#allocation13], 1 }
 0x988   :  { %2369 = vsyncpa [#allocation13 + $0x1], 1 }
 0x989   :  { %2370 = vsyncpa [#allocation16], 1 }
 0x98a   :  { %2372 = vsyncpa [#allocation16 + $0x1], 1 }
 0x98b   :  { %2373 = vsyncpa [#allocation5], 1 }
 0x98c   :  { %2375 = vsyncpa [#allocation5 + $0x1], 1 }

</bundles_post_ra>
